<compile_context>
chip_gen: v6e
topology: v6e:2x2x1
jax: 0.10.0
libtpu: 0.0.40
codegen_flags: <defaults>
</compile_context>

<pallas_src>
import jax
import jax.numpy as jnp
from jax.experimental import pallas as pl
from jax.experimental.pallas import tpu as pltpu
import numpy as np


# ----------------------- stage 1: embedding gather + attention + GRU -----------------------
def attn_gru_kernel(ids_ref,                                   # SMEM scalar prefetch [B] int32
                    hidden_ref, enc_ref, maskb_ref,            # activations
                    awh_ref, aweb_ref, ab_ref, v_ref,          # attention params
                    wie3_ref, wiw3_ref, whh3_ref,              # per-gate GRU weights
                    bih3_ref, bhh3_ref,                        # per-gate GRU biases
                    emb_hbm,                                   # embedding table (HBM, pl.ANY)
                    hnew_ref, a_ref, wt_ref, embout_ref,       # outputs
                    emb_scr, dma_sem):                         # scratch
    B, H = hidden_ref.shape
    f32, bf16 = jnp.float32, jnp.bfloat16

    # Start the embedding row gather first; its first use is after attention, so the
    # B small-row DMAs hide under the attention matmuls/tanh.
    # (ids are clamped in the wrapper, so every row offset is in [0, V).)
    copies = []
    for b in range(B):
        cp = pltpu.make_async_copy(
            emb_hbm.at[pl.ds(ids_ref[b], 1), :],
            emb_scr.at[pl.ds(b, 1), :],
            dma_sem.at[b])
        cp.start()
        copies.append(cp)
    # nn.Dropout is identity at inference; no RNG mask applied.

    hidden = hidden_ref[...]                                   # [B, H] f32
    hid_bf = hidden.astype(bf16)
    enc = enc_ref[...]                                         # [B, S, E2] f32

    # -- additive attention: energy = tanh([hidden; enc] @ W_attn^T + b) --
    hid_part = jnp.dot(hid_bf, awh_ref[...], preferred_element_type=f32)          # [B, H]
    # batched matmul against the per-batch broadcast enc weight: no in-kernel reshape.
    enc_part = jnp.einsum("bse,beh->bsh", enc.astype(bf16), aweb_ref[...],
                          preferred_element_type=f32)                             # [B, S, H]
    energy = jnp.tanh(hid_part[:, None, :] + enc_part + ab_ref[...][None, :, :])
    scores = jnp.sum(energy * v_ref[...][None, :, :], axis=2)                     # [B, S]
    scores = scores + maskb_ref[...]                           # additive -1e10 mask (precomputed)
    m = jnp.max(scores, axis=1, keepdims=True)
    e = jnp.exp(scores - m)
    a = e * pl.reciprocal(jnp.sum(e, axis=1, keepdims=True), approx=True)         # EUP recip
    a_ref[...] = a

    # -- attention-weighted context --
    weighted = jnp.sum(a[:, :, None] * enc, axis=1)            # [B, E2] f32
    wt_ref[...] = weighted
    wt_bf = weighted.astype(bf16)

    # Embeddings are needed from here on: wait for the gather now.
    for cp in copies:
        cp.wait()
    emb_rows = emb_scr[...]                                    # [B, E] f32
    embout_ref[...] = emb_rows
    emb_bf = emb_rows.astype(bf16)

    # -- single-step GRU, PyTorch gate order (r, z, n); per-gate lane-aligned blocks --
    def gi(g):
        return (jnp.dot(emb_bf, wie3_ref[g], preferred_element_type=f32)
                + jnp.dot(wt_bf, wiw3_ref[g], preferred_element_type=f32)
                + bih3_ref[g])
    def gh(g):
        return jnp.dot(hid_bf, whh3_ref[g], preferred_element_type=f32) + bhh3_ref[g]

    r = jax.nn.sigmoid(gi(0) + gh(0))
    z = jax.nn.sigmoid(gi(1) + gh(1))
    n = jnp.tanh(gi(2) + r * gh(2))
    # output == hidden for a 1-step GRU (the module's assert is trivially true).
    hnew_ref[...] = (1.0 - z) * n + z * hidden


# ----------------------- stage 2: fused, vocab-tiled fc_out -----------------------
def fc_kernel(act_ref, fcw_ref, fcb_ref, pred_ref):
    # One fused K=(H+E2+E) MXU pass per vocab tile, lane-dense f32 store.
    pred_ref[...] = (jnp.dot(act_ref[...], fcw_ref[...],
                             preferred_element_type=jnp.float32)
                     + fcb_ref[...])


# ------------------- one-time parameter preparation (hoisted) ----------------
def prepare_decoder_params(p, batch, tv=2048):
    """Transpose / split / pad / cast the PyTorch weights once per model (NOT per
    decode step).  `tv` is the fc_out vocab tile (multiple of 128); size it so the
    double-buffered bf16 weight stream fits the generation's VMEM budget."""
    f32, bf16 = jnp.float32, jnp.bfloat16
    V, E = p["emb"].shape
    H = p["w_hh"].shape[1]
    E2 = p["attn_w"].shape[1] - H
    TV = tv
    Vp = ((V + TV - 1) // TV) * TV

    # attention: input is cat(hidden, enc)
    attn_wT = p["attn_w"].T.astype(f32)                        # [(H+E2), H]
    awe = attn_wT[H:, :].astype(bf16)                          # [E2, H]

    # GRU: input is cat(embedded, weighted); gate order r,z,n
    wihT = p["w_ih"].T.astype(f32)                             # [(E+E2), 3H]
    whhT = p["w_hh"].T.astype(f32)                             # [H, 3H]
    wie3 = jnp.stack([wihT[:E, g * H:(g + 1) * H] for g in range(3)], 0).astype(bf16)   # [3,E,H]
    wiw3 = jnp.stack([wihT[E:, g * H:(g + 1) * H] for g in range(3)], 0).astype(bf16)   # [3,E2,H]
    whh3 = jnp.stack([whhT[:, g * H:(g + 1) * H] for g in range(3)], 0).astype(bf16)    # [3,H,H]
    bih3 = jnp.stack([p["b_ih"][g * H:(g + 1) * H].reshape(1, H) for g in range(3)], 0).astype(f32)
    bhh3 = jnp.stack([p["b_hh"][g * H:(g + 1) * H].reshape(1, H) for g in range(3)], 0).astype(f32)

    # fc_out: single fused weight, rows ordered as cat(output, weighted, embedded)
    fc_w = jnp.pad(p["fc_w"].T.astype(f32), ((0, 0), (0, Vp - V))).astype(bf16)   # [(H+E2+E), Vp]
    fc_b = jnp.pad(p["fc_b"].astype(f32), (0, Vp - V)).reshape(1, Vp)
    # TODO(synk): quantize fc_w to int8 (v5e/v6e) or fp8 (v7x) with per-channel scales.

    return {
        "V": V, "Vp": Vp, "TV": TV, "E": E, "E2": E2, "H": H, "B": batch,
        # embedding table stays f32 in HBM; only B rows are gathered per step.
        "emb": p["emb"].astype(f32),
        "attn_w_hid": attn_wT[:H, :].astype(bf16),                                # [H, H]
        "attn_w_enc_b": jnp.broadcast_to(awe[None, :, :], (batch, E2, H)),        # [B, E2, H]
        "attn_b": p["attn_b"].astype(f32).reshape(1, H),
        "v": p["v_w"].astype(f32).reshape(1, H),
        "wih_emb3": wie3, "wih_wt3": wiw3, "whh3": whh3,
        "b_ih3": bih3, "b_hh3": bhh3,
        "fc_w": fc_w, "fc_b": fc_b,
    }


# ------------------------------- wrapper -------------------------------------
def decoder_forward(ids, hidden, encoder_outputs, mask, prep):
    """ids: [B] int32, hidden: [B,H], encoder_outputs: [S,B,2*enc_hid] (PyTorch layout),
    mask: [B,S] (1=valid, 0=pad).  Returns (prediction[B,V], hidden[B,H], a[B,S])."""
    V, Vp, TV = prep["V"], prep["Vp"], prep["TV"]
    E, E2, H = prep["E"], prep["E2"], prep["H"]
    Kfc = H + E2 + E
    B = ids.shape[0]
    S = encoder_outputs.shape[0]

    enc_b = jnp.transpose(encoder_outputs, (1, 0, 2)).astype(jnp.float32)   # [B, S, E2]
    mask_bias = (mask.astype(jnp.float32) - 1.0) * 1e10                     # 0 or -1e10
    ids = jnp.clip(ids.astype(jnp.int32), 0, V - 1)    # guard the HBM row gather
    hidden = hidden.astype(jnp.float32)

    def res(shape):
        nd = len(shape)
        return pl.BlockSpec(shape, lambda i, ids_ref, nd=nd: (0,) * nd)

    # ---- stage 1: attention + GRU (+ embedding gather), single grid step ----
    h_new, a, weighted, emb_rows = pl.pallas_call(
        attn_gru_kernel,
        out_shape=(jax.ShapeDtypeStruct((B, H), jnp.float32),
                   jax.ShapeDtypeStruct((B, S), jnp.float32),
                   jax.ShapeDtypeStruct((B, E2), jnp.float32),
                   jax.ShapeDtypeStruct((B, E), jnp.float32)),
        grid_spec=pltpu.PrefetchScalarGridSpec(
            num_scalar_prefetch=1,                   # token ids -> SMEM before the grid runs
            grid=(1,),
            in_specs=[
                res((B, H)),                         # hidden
                res((B, S, E2)),                     # encoder outputs (batch-major)
                res((B, S)),                         # additive mask bias
                res((H, H)),                         # attn weight, hidden part
                res((B, E2, H)),                     # attn weight, enc part (batch-broadcast)
                res((1, H)),                         # attn bias
                res((1, H)),                         # v
                res((3, E, H)),                      # GRU w_ih (embedded part), per gate
                res((3, E2, H)),                     # GRU w_ih (weighted part), per gate
                res((3, H, H)),                      # GRU w_hh, per gate
                res((3, 1, H)),                      # b_ih per gate
                res((3, 1, H)),                      # b_hh per gate
                pl.BlockSpec(memory_space=pl.ANY),   # embedding table (HBM; in-kernel row DMA)
            ],
            out_specs=[res((B, H)), res((B, S)), res((B, E2)), res((B, E))],
            scratch_shapes=[
                pltpu.VMEM((B, E), jnp.float32),     # gathered embedding rows
                pltpu.SemaphoreType.DMA((B,)),
            ]),
        compiler_params=pltpu.CompilerParams(
            dimension_semantics=("arbitrary",),
            vmem_limit_bytes=32 * 1024 * 1024),
    )(ids, hidden, enc_b, mask_bias,
      prep["attn_w_hid"], prep["attn_w_enc_b"], prep["attn_b"], prep["v"],
      prep["wih_emb3"], prep["wih_wt3"], prep["whh3"], prep["b_ih3"], prep["b_hh3"],
      prep["emb"])

    # ---- stage 2: fused fc_out on cat(output, weighted, embedded), vocab-tiled ----
    # Trivial XLA concat+cast of three tiny [B, *] blocks -> one bf16 activation slab,
    # so the fc kernel streams a single weight and does one MXU pass per tile.
    act = jnp.concatenate([h_new, weighted, emb_rows], axis=1).astype(jnp.bfloat16)  # [B, Kfc]
    n_vt = Vp // TV
    pred_p = pl.pallas_call(
        fc_kernel,
        out_shape=jax.ShapeDtypeStruct((B, Vp), jnp.float32),
        grid_spec=pltpu.PrefetchScalarGridSpec(
            num_scalar_prefetch=0,
            grid=(n_vt,),
            in_specs=[
                pl.BlockSpec((B, Kfc), lambda j: (0, 0)),     # resident fused activation
                pl.BlockSpec((Kfc, TV), lambda j: (0, j)),    # fused fc weight tile (streamed)
                pl.BlockSpec((1, TV), lambda j: (0, j)),      # fc bias tile
            ],
            out_specs=pl.BlockSpec((B, TV), lambda j: (0, j))),  # lane-dense logits tile
        compiler_params=pltpu.CompilerParams(
            # stateless per tile -> safe to shard across both v7x TensorCores
            dimension_semantics=("parallel",),
            # bf16 weight stream @ TV=2048 is ~0.4 MiB/tile double-buffered; 32 MiB is
            # safe on every generation.  Raise (and TV) on v6e/v5e's 128 MiB VMEM.
            vmem_limit_bytes=32 * 1024 * 1024),
    )(act, prep["fc_w"], prep["fc_b"])

    return pred_p[:, :V], h_new, a


# ------------------------------ plain-JAX reference --------------------------
def decoder_ref(ids, hidden, encoder_outputs, mask, p):
    """Mirrors the PyTorch module; matmul operands rounded to bf16 (like the kernel/MXU),
    accumulation and element-wise math in f32."""
    f32 = jnp.float32
    rnd = lambda x: x.astype(jnp.bfloat16).astype(f32)
    mm = lambda x, w: jnp.dot(rnd(x), rnd(w), preferred_element_type=f32)

    embedded = p["emb"].astype(f32)[ids]                                 # [B, E]
    enc_b = jnp.transpose(encoder_outputs, (1, 0, 2)).astype(f32)        # [B, S, E2]
    B, S, E2 = enc_b.shape
    H = hidden.shape[1]
    hid_rep = jnp.repeat(hidden[:, None, :], S, axis=1)
    cat = jnp.concatenate([hid_rep, enc_b], axis=2).reshape(B * S, H + E2)
    energy = jnp.tanh(mm(cat, p["attn_w"].T).reshape(B, S, H) + p["attn_b"])
    scores = jnp.einsum("bsh,h->bs", energy, p["v_w"][0])
    scores = jnp.where(mask == 0, -1e10, scores)
    a = jax.nn.softmax(scores, axis=1)
    weighted = jnp.einsum("bs,bse->be", a, enc_b)
    x = jnp.concatenate([embedded, weighted], axis=1)
    gi = mm(x, p["w_ih"].T) + p["b_ih"]
    gh = mm(hidden, p["w_hh"].T) + p["b_hh"]
    r = jax.nn.sigmoid(gi[:, :H] + gh[:, :H])
    z = jax.nn.sigmoid(gi[:, H:2 * H] + gh[:, H:2 * H])
    n = jnp.tanh(gi[:, 2 * H:] + r * gh[:, 2 * H:])
    h_new = (1.0 - z) * n + z * hidden
    pred = mm(jnp.concatenate([h_new, weighted, embedded], axis=1), p["fc_w"].T) + p["fc_b"]
    return pred, h_new, a


# ---------------------------------- main --------------------------------------
if __name__ == "__main__":
    key = jax.random.PRNGKey(0)

    # output_dim=V, emb_dim=E, enc_hid_dim, dec_hid_dim=H.
    # V chosen so the TV=2048 vocab tiling is actually exercised (Vp=6144 -> 3 tiles).
    V, E, ENC_HID, H = 5000, 32, 16, 32
    E2 = 2 * ENC_HID
    B, S = 8, 16

    keys = jax.random.split(key, 16)
    scale = 0.1
    params = {
        "emb":    jax.random.normal(keys[0], (V, E), jnp.float32),
        "attn_w": scale * jax.random.normal(keys[1], (H, E2 + H), jnp.float32),
        "attn_b": scale * jax.random.normal(keys[2], (H,), jnp.float32),
        "v_w":    scale * jax.random.normal(keys[3], (1, H), jnp.float32),
        "w_ih":   scale * jax.random.normal(keys[4], (3 * H, E2 + E), jnp.float32),
        "w_hh":   scale * jax.random.normal(keys[5], (3 * H, H), jnp.float32),
        "b_ih":   scale * jax.random.normal(keys[6], (3 * H,), jnp.float32),
        "b_hh":   scale * jax.random.normal(keys[7], (3 * H,), jnp.float32),
        "fc_w":   scale * jax.random.normal(keys[8], (V, E2 + H + E), jnp.float32),
        "fc_b":   scale * jax.random.normal(keys[9], (V,), jnp.float32),
    }

    ids = jax.random.randint(keys[10], (B,), 0, V, dtype=jnp.int32)
    hidden = jax.random.normal(keys[11], (B, H), jnp.float32)
    encoder_outputs = jax.random.normal(keys[12], (S, B, E2), jnp.float32)
    lengths = jnp.array([16, 12, 9, 16, 5, 14, 7, 11], dtype=jnp.int32)
    mask = (jnp.arange(S)[None, :] < lengths[:, None]).astype(jnp.float32)   # [B, S]

    prep = prepare_decoder_params(params, batch=B, tv=2048)   # one-time, outside the decode loop

    pred, h_new, a = decoder_forward(ids, hidden, encoder_outputs, mask, prep)
    jax.block_until_ready((pred, h_new, a))

    pred_r, h_r, a_r = decoder_ref(ids, hidden, encoder_outputs, mask, params)
    # Tolerance covers bf16 operand rounding plus the EUP approximate-reciprocal
    # softmax normalization; real semantic errors would be orders of magnitude larger.
    tol = dict(rtol=5e-3, atol=5e-3)
    np.testing.assert_allclose(np.asarray(a), np.asarray(a_r), **tol)
    np.testing.assert_allclose(np.asarray(h_new), np.asarray(h_r), **tol)
    np.testing.assert_allclose(np.asarray(pred), np.asarray(pred_r), **tol)

    print("KERNEL_OK")
</pallas_src>

<mosaic_0001>
module attributes {stable_mosaic.version = 11 : i64} {
  func.func @attn_gru_kernel(%arg0: i32, %arg1: memref<8xi32, #tpu.memory_space<smem>>, %arg2: memref<8x32xf32, #tpu.memory_space<vmem>>, %arg3: memref<8x16x32xf32, #tpu.memory_space<vmem>>, %arg4: memref<8x16xf32, #tpu.memory_space<vmem>>, %arg5: memref<32x32xbf16, #tpu.memory_space<vmem>>, %arg6: memref<8x32x32xbf16, #tpu.memory_space<vmem>>, %arg7: memref<1x32xf32, #tpu.memory_space<vmem>>, %arg8: memref<1x32xf32, #tpu.memory_space<vmem>>, %arg9: memref<3x32x32xbf16, #tpu.memory_space<vmem>>, %arg10: memref<3x32x32xbf16, #tpu.memory_space<vmem>>, %arg11: memref<3x32x32xbf16, #tpu.memory_space<vmem>>, %arg12: memref<3x1x32xf32, #tpu.memory_space<vmem>>, %arg13: memref<3x1x32xf32, #tpu.memory_space<vmem>>, %arg14: memref<5000x32xf32, #tpu.memory_space<any>>, %arg15: memref<8x32xf32, #tpu.memory_space<vmem>>, %arg16: memref<8x16xf32, #tpu.memory_space<vmem>>, %arg17: memref<8x32xf32, #tpu.memory_space<vmem>>, %arg18: memref<8x32xf32, #tpu.memory_space<vmem>>, %arg19: memref<8x32xf32, #tpu.memory_space<vmem>>, %arg20: memref<8x!tpu.dma_semaphore, #tpu.memory_space<semaphore_mem>>) attributes {dimension_semantics = [#tpu.dimension_semantics<arbitrary>], iteration_bounds = array<i64: 1>, scalar_prefetch = 1 : i64, scratch_operands = 2 : i64, tpu.core_type = #tpu.core_type<tc>, window_params = [{pipeline_mode = #tpu.pipeline_mode<synchronous>, transform_indices = @transform_0, window_bounds = array<i64: 8, 32>}, {pipeline_mode = #tpu.pipeline_mode<synchronous>, transform_indices = @transform_1, window_bounds = array<i64: 8, 16, 32>}, {pipeline_mode = #tpu.pipeline_mode<synchronous>, transform_indices = @transform_2, window_bounds = array<i64: 8, 16>}, {pipeline_mode = #tpu.pipeline_mode<synchronous>, transform_indices = @transform_3, window_bounds = array<i64: 32, 32>}, {pipeline_mode = #tpu.pipeline_mode<synchronous>, transform_indices = @transform_4, window_bounds = array<i64: 8, 32, 32>}, {pipeline_mode = #tpu.pipeline_mode<synchronous>, transform_indices = @transform_5, window_bounds = array<i64: 1, 32>}, {pipeline_mode = #tpu.pipeline_mode<synchronous>, transform_indices = @transform_6, window_bounds = array<i64: 1, 32>}, {pipeline_mode = #tpu.pipeline_mode<synchronous>, transform_indices = @transform_7, window_bounds = array<i64: 3, 32, 32>}, {pipeline_mode = #tpu.pipeline_mode<synchronous>, transform_indices = @transform_8, window_bounds = array<i64: 3, 32, 32>}, {pipeline_mode = #tpu.pipeline_mode<synchronous>, transform_indices = @transform_9, window_bounds = array<i64: 3, 32, 32>}, {pipeline_mode = #tpu.pipeline_mode<synchronous>, transform_indices = @transform_10, window_bounds = array<i64: 3, 1, 32>}, {pipeline_mode = #tpu.pipeline_mode<synchronous>, transform_indices = @transform_11, window_bounds = array<i64: 3, 1, 32>}, {}, {pipeline_mode = #tpu.pipeline_mode<synchronous>, transform_indices = @transform_13, window_bounds = array<i64: 8, 32>}, {pipeline_mode = #tpu.pipeline_mode<synchronous>, transform_indices = @transform_14, window_bounds = array<i64: 8, 16>}, {pipeline_mode = #tpu.pipeline_mode<synchronous>, transform_indices = @transform_15, window_bounds = array<i64: 8, 32>}, {pipeline_mode = #tpu.pipeline_mode<synchronous>, transform_indices = @transform_16, window_bounds = array<i64: 8, 32>}]} {
    %c0 = arith.constant 0 : index
    %0 = memref.load %arg1[%c0] : memref<8xi32, #tpu.memory_space<smem>>
    %c0_i32 = arith.constant 0 : i32
    %c0_i32_0 = arith.constant 0 : i32
    %1 = tpu.memref_slice %arg14[%0, %c0_i32_0] : memref<5000x32xf32, #tpu.memory_space<any>> -> memref<1x32xf32, #tpu.memory_space<any>>
    %c0_i32_1 = arith.constant 0 : i32
    %c0_i32_2 = arith.constant 0 : i32
    %2 = tpu.memref_slice %arg19[%c0_i32_1, %c0_i32_2] : memref<8x32xf32, #tpu.memory_space<vmem>> -> memref<1x32xf32, #tpu.memory_space<vmem>>
    %3 = tpu.memref_slice %arg20[%c0_i32] : memref<8x!tpu.dma_semaphore, #tpu.memory_space<semaphore_mem>> -> memref<1x!tpu.dma_semaphore, #tpu.memory_space<semaphore_mem>>
    %4 = tpu.memref_squeeze %3 : memref<1x!tpu.dma_semaphore, #tpu.memory_space<semaphore_mem>> -> memref<!tpu.dma_semaphore, #tpu.memory_space<semaphore_mem>>
    tpu.enqueue_dma source(%1 : memref<1x32xf32, #tpu.memory_space<any>>) target(%2 : memref<1x32xf32, #tpu.memory_space<vmem>>) target_semaphore(%4 : memref<!tpu.dma_semaphore, #tpu.memory_space<semaphore_mem>>)
    %c1 = arith.constant 1 : index
    %5 = memref.load %arg1[%c1] : memref<8xi32, #tpu.memory_space<smem>>
    %c1_i32 = arith.constant 1 : i32
    %c0_i32_3 = arith.constant 0 : i32
    %6 = tpu.memref_slice %arg14[%5, %c0_i32_3] : memref<5000x32xf32, #tpu.memory_space<any>> -> memref<1x32xf32, #tpu.memory_space<any>>
    %c1_i32_4 = arith.constant 1 : i32
    %c0_i32_5 = arith.constant 0 : i32
    %7 = tpu.memref_slice %arg19[%c1_i32_4, %c0_i32_5] : memref<8x32xf32, #tpu.memory_space<vmem>> -> memref<1x32xf32, #tpu.memory_space<vmem>>
    %8 = tpu.memref_slice %arg20[%c1_i32] : memref<8x!tpu.dma_semaphore, #tpu.memory_space<semaphore_mem>> -> memref<1x!tpu.dma_semaphore, #tpu.memory_space<semaphore_mem>>
    %9 = tpu.memref_squeeze %8 : memref<1x!tpu.dma_semaphore, #tpu.memory_space<semaphore_mem>> -> memref<!tpu.dma_semaphore, #tpu.memory_space<semaphore_mem>>
    tpu.enqueue_dma source(%6 : memref<1x32xf32, #tpu.memory_space<any>>) target(%7 : memref<1x32xf32, #tpu.memory_space<vmem>>) target_semaphore(%9 : memref<!tpu.dma_semaphore, #tpu.memory_space<semaphore_mem>>)
    %c2 = arith.constant 2 : index
    %10 = memref.load %arg1[%c2] : memref<8xi32, #tpu.memory_space<smem>>
    %c2_i32 = arith.constant 2 : i32
    %c0_i32_6 = arith.constant 0 : i32
    %11 = tpu.memref_slice %arg14[%10, %c0_i32_6] : memref<5000x32xf32, #tpu.memory_space<any>> -> memref<1x32xf32, #tpu.memory_space<any>>
    %c2_i32_7 = arith.constant 2 : i32
    %c0_i32_8 = arith.constant 0 : i32
    %12 = tpu.memref_slice %arg19[%c2_i32_7, %c0_i32_8] : memref<8x32xf32, #tpu.memory_space<vmem>> -> memref<1x32xf32, #tpu.memory_space<vmem>>
    %13 = tpu.memref_slice %arg20[%c2_i32] : memref<8x!tpu.dma_semaphore, #tpu.memory_space<semaphore_mem>> -> memref<1x!tpu.dma_semaphore, #tpu.memory_space<semaphore_mem>>
    %14 = tpu.memref_squeeze %13 : memref<1x!tpu.dma_semaphore, #tpu.memory_space<semaphore_mem>> -> memref<!tpu.dma_semaphore, #tpu.memory_space<semaphore_mem>>
    tpu.enqueue_dma source(%11 : memref<1x32xf32, #tpu.memory_space<any>>) target(%12 : memref<1x32xf32, #tpu.memory_space<vmem>>) target_semaphore(%14 : memref<!tpu.dma_semaphore, #tpu.memory_space<semaphore_mem>>)
    %c3 = arith.constant 3 : index
    %15 = memref.load %arg1[%c3] : memref<8xi32, #tpu.memory_space<smem>>
    %c3_i32 = arith.constant 3 : i32
    %c0_i32_9 = arith.constant 0 : i32
    %16 = tpu.memref_slice %arg14[%15, %c0_i32_9] : memref<5000x32xf32, #tpu.memory_space<any>> -> memref<1x32xf32, #tpu.memory_space<any>>
    %c3_i32_10 = arith.constant 3 : i32
    %c0_i32_11 = arith.constant 0 : i32
    %17 = tpu.memref_slice %arg19[%c3_i32_10, %c0_i32_11] : memref<8x32xf32, #tpu.memory_space<vmem>> -> memref<1x32xf32, #tpu.memory_space<vmem>>
    %18 = tpu.memref_slice %arg20[%c3_i32] : memref<8x!tpu.dma_semaphore, #tpu.memory_space<semaphore_mem>> -> memref<1x!tpu.dma_semaphore, #tpu.memory_space<semaphore_mem>>
    %19 = tpu.memref_squeeze %18 : memref<1x!tpu.dma_semaphore, #tpu.memory_space<semaphore_mem>> -> memref<!tpu.dma_semaphore, #tpu.memory_space<semaphore_mem>>
    tpu.enqueue_dma source(%16 : memref<1x32xf32, #tpu.memory_space<any>>) target(%17 : memref<1x32xf32, #tpu.memory_space<vmem>>) target_semaphore(%19 : memref<!tpu.dma_semaphore, #tpu.memory_space<semaphore_mem>>)
    %c4 = arith.constant 4 : index
    %20 = memref.load %arg1[%c4] : memref<8xi32, #tpu.memory_space<smem>>
    %c4_i32 = arith.constant 4 : i32
    %c0_i32_12 = arith.constant 0 : i32
    %21 = tpu.memref_slice %arg14[%20, %c0_i32_12] : memref<5000x32xf32, #tpu.memory_space<any>> -> memref<1x32xf32, #tpu.memory_space<any>>
    %c4_i32_13 = arith.constant 4 : i32
    %c0_i32_14 = arith.constant 0 : i32
    %22 = tpu.memref_slice %arg19[%c4_i32_13, %c0_i32_14] : memref<8x32xf32, #tpu.memory_space<vmem>> -> memref<1x32xf32, #tpu.memory_space<vmem>>
    %23 = tpu.memref_slice %arg20[%c4_i32] : memref<8x!tpu.dma_semaphore, #tpu.memory_space<semaphore_mem>> -> memref<1x!tpu.dma_semaphore, #tpu.memory_space<semaphore_mem>>
    %24 = tpu.memref_squeeze %23 : memref<1x!tpu.dma_semaphore, #tpu.memory_space<semaphore_mem>> -> memref<!tpu.dma_semaphore, #tpu.memory_space<semaphore_mem>>
    tpu.enqueue_dma source(%21 : memref<1x32xf32, #tpu.memory_space<any>>) target(%22 : memref<1x32xf32, #tpu.memory_space<vmem>>) target_semaphore(%24 : memref<!tpu.dma_semaphore, #tpu.memory_space<semaphore_mem>>)
    %c5 = arith.constant 5 : index
    %25 = memref.load %arg1[%c5] : memref<8xi32, #tpu.memory_space<smem>>
    %c5_i32 = arith.constant 5 : i32
    %c0_i32_15 = arith.constant 0 : i32
    %26 = tpu.memref_slice %arg14[%25, %c0_i32_15] : memref<5000x32xf32, #tpu.memory_space<any>> -> memref<1x32xf32, #tpu.memory_space<any>>
    %c5_i32_16 = arith.constant 5 : i32
    %c0_i32_17 = arith.constant 0 : i32
    %27 = tpu.memref_slice %arg19[%c5_i32_16, %c0_i32_17] : memref<8x32xf32, #tpu.memory_space<vmem>> -> memref<1x32xf32, #tpu.memory_space<vmem>>
    %28 = tpu.memref_slice %arg20[%c5_i32] : memref<8x!tpu.dma_semaphore, #tpu.memory_space<semaphore_mem>> -> memref<1x!tpu.dma_semaphore, #tpu.memory_space<semaphore_mem>>
    %29 = tpu.memref_squeeze %28 : memref<1x!tpu.dma_semaphore, #tpu.memory_space<semaphore_mem>> -> memref<!tpu.dma_semaphore, #tpu.memory_space<semaphore_mem>>
    tpu.enqueue_dma source(%26 : memref<1x32xf32, #tpu.memory_space<any>>) target(%27 : memref<1x32xf32, #tpu.memory_space<vmem>>) target_semaphore(%29 : memref<!tpu.dma_semaphore, #tpu.memory_space<semaphore_mem>>)
    %c6 = arith.constant 6 : index
    %30 = memref.load %arg1[%c6] : memref<8xi32, #tpu.memory_space<smem>>
    %c6_i32 = arith.constant 6 : i32
    %c0_i32_18 = arith.constant 0 : i32
    %31 = tpu.memref_slice %arg14[%30, %c0_i32_18] : memref<5000x32xf32, #tpu.memory_space<any>> -> memref<1x32xf32, #tpu.memory_space<any>>
    %c6_i32_19 = arith.constant 6 : i32
    %c0_i32_20 = arith.constant 0 : i32
    %32 = tpu.memref_slice %arg19[%c6_i32_19, %c0_i32_20] : memref<8x32xf32, #tpu.memory_space<vmem>> -> memref<1x32xf32, #tpu.memory_space<vmem>>
    %33 = tpu.memref_slice %arg20[%c6_i32] : memref<8x!tpu.dma_semaphore, #tpu.memory_space<semaphore_mem>> -> memref<1x!tpu.dma_semaphore, #tpu.memory_space<semaphore_mem>>
    %34 = tpu.memref_squeeze %33 : memref<1x!tpu.dma_semaphore, #tpu.memory_space<semaphore_mem>> -> memref<!tpu.dma_semaphore, #tpu.memory_space<semaphore_mem>>
    tpu.enqueue_dma source(%31 : memref<1x32xf32, #tpu.memory_space<any>>) target(%32 : memref<1x32xf32, #tpu.memory_space<vmem>>) target_semaphore(%34 : memref<!tpu.dma_semaphore, #tpu.memory_space<semaphore_mem>>)
    %c7 = arith.constant 7 : index
    %35 = memref.load %arg1[%c7] : memref<8xi32, #tpu.memory_space<smem>>
    %c7_i32 = arith.constant 7 : i32
    %c0_i32_21 = arith.constant 0 : i32
    %36 = tpu.memref_slice %arg14[%35, %c0_i32_21] : memref<5000x32xf32, #tpu.memory_space<any>> -> memref<1x32xf32, #tpu.memory_space<any>>
    %c7_i32_22 = arith.constant 7 : i32
    %c0_i32_23 = arith.constant 0 : i32
    %37 = tpu.memref_slice %arg19[%c7_i32_22, %c0_i32_23] : memref<8x32xf32, #tpu.memory_space<vmem>> -> memref<1x32xf32, #tpu.memory_space<vmem>>
    %38 = tpu.memref_slice %arg20[%c7_i32] : memref<8x!tpu.dma_semaphore, #tpu.memory_space<semaphore_mem>> -> memref<1x!tpu.dma_semaphore, #tpu.memory_space<semaphore_mem>>
    %39 = tpu.memref_squeeze %38 : memref<1x!tpu.dma_semaphore, #tpu.memory_space<semaphore_mem>> -> memref<!tpu.dma_semaphore, #tpu.memory_space<semaphore_mem>>
    tpu.enqueue_dma source(%36 : memref<1x32xf32, #tpu.memory_space<any>>) target(%37 : memref<1x32xf32, #tpu.memory_space<vmem>>) target_semaphore(%39 : memref<!tpu.dma_semaphore, #tpu.memory_space<semaphore_mem>>)
    %c0_24 = arith.constant 0 : index
    %c0_25 = arith.constant 0 : index
    %40 = vector.load %arg2[%c0_24, %c0_25] : memref<8x32xf32, #tpu.memory_space<vmem>>, vector<8x32xf32>
    %41 = arith.truncf %40 : vector<8x32xf32> to vector<8x32xbf16>
    %c0_26 = arith.constant 0 : index
    %c0_27 = arith.constant 0 : index
    %c0_28 = arith.constant 0 : index
    %42 = vector.load %arg3[%c0_26, %c0_27, %c0_28] : memref<8x16x32xf32, #tpu.memory_space<vmem>>, vector<8x16x32xf32>
    %c0_29 = arith.constant 0 : index
    %c0_30 = arith.constant 0 : index
    %43 = vector.load %arg5[%c0_29, %c0_30] : memref<32x32xbf16, #tpu.memory_space<vmem>>, vector<32x32xbf16>
    %cst = arith.constant dense<0.000000e+00> : vector<8x32xf32>
    %44 = tpu.matmul %41, %43, %cst {dimension_numbers = #tpu.dot_dimension_numbers<[1], [0], [0], [1], [0, 0, 1, 1], [], []>} : vector<8x32xbf16>, vector<32x32xbf16>, vector<8x32xf32> -> vector<8x32xf32>
    %45 = arith.truncf %42 : vector<8x16x32xf32> to vector<8x16x32xbf16>
    %c0_31 = arith.constant 0 : index
    %c0_32 = arith.constant 0 : index
    %c0_33 = arith.constant 0 : index
    %46 = vector.load %arg6[%c0_31, %c0_32, %c0_33] : memref<8x32x32xbf16, #tpu.memory_space<vmem>>, vector<8x32x32xbf16>
    "tpu.trace_start"() <{level = 10 : i32, message = "bse,beh->bsh"}> : () -> ()
    %cst_34 = arith.constant dense<0.000000e+00> : vector<8x16x32xf32>
    %47 = tpu.matmul %45, %46, %cst_34 {dimension_numbers = #tpu.dot_dimension_numbers<[2], [1], [1], [2], [0, 0, 0, 1, 1, 2], [0], [0]>} : vector<8x16x32xbf16>, vector<8x32x32xbf16>, vector<8x16x32xf32> -> vector<8x16x32xf32>
    "tpu.trace_stop"() : () -> ()
    %48 = vector.shape_cast %44 : vector<8x32xf32> to vector<8x1x32xf32>
    %49 = vector.broadcast %48 : vector<8x1x32xf32> to vector<8x16x32xf32>
    %50 = arith.addf %49, %47 : vector<8x16x32xf32>
    %c0_35 = arith.constant 0 : index
    %c0_36 = arith.constant 0 : index
    %51 = vector.load %arg7[%c0_35, %c0_36] : memref<1x32xf32, #tpu.memory_space<vmem>>, vector<1x32xf32>
    %52 = vector.shape_cast %51 : vector<1x32xf32> to vector<1x1x32xf32>
    %53 = vector.broadcast %52 : vector<1x1x32xf32> to vector<8x16x32xf32>
    %54 = arith.addf %50, %53 : vector<8x16x32xf32>
    %55 = math.tanh %54 : vector<8x16x32xf32>
    %c0_37 = arith.constant 0 : index
    %c0_38 = arith.constant 0 : index
    %56 = vector.load %arg8[%c0_37, %c0_38] : memref<1x32xf32, #tpu.memory_space<vmem>>, vector<1x32xf32>
    %57 = vector.shape_cast %56 : vector<1x32xf32> to vector<1x1x32xf32>
    %58 = vector.broadcast %57 : vector<1x1x32xf32> to vector<8x16x32xf32>
    %59 = arith.mulf %55, %58 : vector<8x16x32xf32>
    %cst_39 = arith.constant dense<0.000000e+00> : vector<8x16xf32>
    %60 = vector.multi_reduction <add>, %59, %cst_39 [2] : vector<8x16x32xf32> to vector<8x16xf32>
    %c0_40 = arith.constant 0 : index
    %c0_41 = arith.constant 0 : index
    %61 = vector.load %arg4[%c0_40, %c0_41] : memref<8x16xf32, #tpu.memory_space<vmem>>, vector<8x16xf32>
    %62 = arith.addf %60, %61 : vector<8x16xf32>
    %cst_42 = arith.constant dense<0xFF800000> : vector<8xf32>
    %63 = vector.multi_reduction <maximumf>, %62, %cst_42 [1] : vector<8x16xf32> to vector<8xf32>
    %64 = vector.shape_cast %63 : vector<8xf32> to vector<8x1xf32>
    %65 = vector.broadcast %64 : vector<8x1xf32> to vector<8x16xf32>
    %66 = arith.subf %62, %65 : vector<8x16xf32>
    %67 = math.exp %66 : vector<8x16xf32>
    %cst_43 = arith.constant dense<0.000000e+00> : vector<8xf32>
    %68 = vector.multi_reduction <add>, %67, %cst_43 [1] : vector<8x16xf32> to vector<8xf32>
    %69 = vector.shape_cast %68 : vector<8xf32> to vector<8x1xf32>
    %70 = tpu.reciprocal %69 {approx = true} : vector<8x1xf32> -> vector<8x1xf32>
    %71 = vector.broadcast %70 : vector<8x1xf32> to vector<8x16xf32>
    %72 = arith.mulf %67, %71 : vector<8x16xf32>
    %c0_44 = arith.constant 0 : index
    %c0_45 = arith.constant 0 : index
    %73 = vector.load %arg16[%c0_44, %c0_45] : memref<8x16xf32, #tpu.memory_space<vmem>>, vector<8x16xf32>
    tpu.vector_store %arg16[%c0_44, %c0_45], %72 {strides = array<i32>} : memref<8x16xf32, #tpu.memory_space<vmem>>, vector<8x16xf32>,
    %74 = vector.shape_cast %72 : vector<8x16xf32> to vector<8x16x1xf32>
    %75 = vector.broadcast %74 : vector<8x16x1xf32> to vector<8x16x32xf32>
    %76 = arith.mulf %75, %42 : vector<8x16x32xf32>
    %cst_46 = arith.constant dense<0.000000e+00> : vector<8x32xf32>
    %77 = vector.multi_reduction <add>, %76, %cst_46 [1] : vector<8x16x32xf32> to vector<8x32xf32>
    %c0_47 = arith.constant 0 : index
    %c0_48 = arith.constant 0 : index
    %78 = vector.load %arg17[%c0_47, %c0_48] : memref<8x32xf32, #tpu.memory_space<vmem>>, vector<8x32xf32>
    tpu.vector_store %arg17[%c0_47, %c0_48], %77 {strides = array<i32>} : memref<8x32xf32, #tpu.memory_space<vmem>>, vector<8x32xf32>,
    %79 = arith.truncf %77 : vector<8x32xf32> to vector<8x32xbf16>
    %c0_i32_49 = arith.constant 0 : i32
    %c0_i32_50 = arith.constant 0 : i32
    %80 = tpu.memref_slice %arg14[%0, %c0_i32_50] : memref<5000x32xf32, #tpu.memory_space<any>> -> memref<1x32xf32, #tpu.memory_space<any>>
    %c0_i32_51 = arith.constant 0 : i32
    %c0_i32_52 = arith.constant 0 : i32
    %81 = tpu.memref_slice %arg19[%c0_i32_51, %c0_i32_52] : memref<8x32xf32, #tpu.memory_space<vmem>> -> memref<1x32xf32, #tpu.memory_space<vmem>>
    %82 = tpu.memref_slice %arg20[%c0_i32_49] : memref<8x!tpu.dma_semaphore, #tpu.memory_space<semaphore_mem>> -> memref<1x!tpu.dma_semaphore, #tpu.memory_space<semaphore_mem>>
    %83 = tpu.memref_squeeze %82 : memref<1x!tpu.dma_semaphore, #tpu.memory_space<semaphore_mem>> -> memref<!tpu.dma_semaphore, #tpu.memory_space<semaphore_mem>>
    tpu.wait_dma2 semaphore(%83 : memref<!tpu.dma_semaphore, #tpu.memory_space<semaphore_mem>>) src(%80 : memref<1x32xf32, #tpu.memory_space<any>>) dst(%81 : memref<1x32xf32, #tpu.memory_space<vmem>>)
    %c1_i32_53 = arith.constant 1 : i32
    %c0_i32_54 = arith.constant 0 : i32
    %84 = tpu.memref_slice %arg14[%5, %c0_i32_54] : memref<5000x32xf32, #tpu.memory_space<any>> -> memref<1x32xf32, #tpu.memory_space<any>>
    %c1_i32_55 = arith.constant 1 : i32
    %c0_i32_56 = arith.constant 0 : i32
    %85 = tpu.memref_slice %arg19[%c1_i32_55, %c0_i32_56] : memref<8x32xf32, #tpu.memory_space<vmem>> -> memref<1x32xf32, #tpu.memory_space<vmem>>
    %86 = tpu.memref_slice %arg20[%c1_i32_53] : memref<8x!tpu.dma_semaphore, #tpu.memory_space<semaphore_mem>> -> memref<1x!tpu.dma_semaphore, #tpu.memory_space<semaphore_mem>>
    %87 = tpu.memref_squeeze %86 : memref<1x!tpu.dma_semaphore, #tpu.memory_space<semaphore_mem>> -> memref<!tpu.dma_semaphore, #tpu.memory_space<semaphore_mem>>
    tpu.wait_dma2 semaphore(%87 : memref<!tpu.dma_semaphore, #tpu.memory_space<semaphore_mem>>) src(%84 : memref<1x32xf32, #tpu.memory_space<any>>) dst(%85 : memref<1x32xf32, #tpu.memory_space<vmem>>)
    %c2_i32_57 = arith.constant 2 : i32
    %c0_i32_58 = arith.constant 0 : i32
    %88 = tpu.memref_slice %arg14[%10, %c0_i32_58] : memref<5000x32xf32, #tpu.memory_space<any>> -> memref<1x32xf32, #tpu.memory_space<any>>
    %c2_i32_59 = arith.constant 2 : i32
    %c0_i32_60 = arith.constant 0 : i32
    %89 = tpu.memref_slice %arg19[%c2_i32_59, %c0_i32_60] : memref<8x32xf32, #tpu.memory_space<vmem>> -> memref<1x32xf32, #tpu.memory_space<vmem>>
    %90 = tpu.memref_slice %arg20[%c2_i32_57] : memref<8x!tpu.dma_semaphore, #tpu.memory_space<semaphore_mem>> -> memref<1x!tpu.dma_semaphore, #tpu.memory_space<semaphore_mem>>
    %91 = tpu.memref_squeeze %90 : memref<1x!tpu.dma_semaphore, #tpu.memory_space<semaphore_mem>> -> memref<!tpu.dma_semaphore, #tpu.memory_space<semaphore_mem>>
    tpu.wait_dma2 semaphore(%91 : memref<!tpu.dma_semaphore, #tpu.memory_space<semaphore_mem>>) src(%88 : memref<1x32xf32, #tpu.memory_space<any>>) dst(%89 : memref<1x32xf32, #tpu.memory_space<vmem>>)
    %c3_i32_61 = arith.constant 3 : i32
    %c0_i32_62 = arith.constant 0 : i32
    %92 = tpu.memref_slice %arg14[%15, %c0_i32_62] : memref<5000x32xf32, #tpu.memory_space<any>> -> memref<1x32xf32, #tpu.memory_space<any>>
    %c3_i32_63 = arith.constant 3 : i32
    %c0_i32_64 = arith.constant 0 : i32
    %93 = tpu.memref_slice %arg19[%c3_i32_63, %c0_i32_64] : memref<8x32xf32, #tpu.memory_space<vmem>> -> memref<1x32xf32, #tpu.memory_space<vmem>>
    %94 = tpu.memref_slice %arg20[%c3_i32_61] : memref<8x!tpu.dma_semaphore, #tpu.memory_space<semaphore_mem>> -> memref<1x!tpu.dma_semaphore, #tpu.memory_space<semaphore_mem>>
    %95 = tpu.memref_squeeze %94 : memref<1x!tpu.dma_semaphore, #tpu.memory_space<semaphore_mem>> -> memref<!tpu.dma_semaphore, #tpu.memory_space<semaphore_mem>>
    tpu.wait_dma2 semaphore(%95 : memref<!tpu.dma_semaphore, #tpu.memory_space<semaphore_mem>>) src(%92 : memref<1x32xf32, #tpu.memory_space<any>>) dst(%93 : memref<1x32xf32, #tpu.memory_space<vmem>>)
    %c4_i32_65 = arith.constant 4 : i32
    %c0_i32_66 = arith.constant 0 : i32
    %96 = tpu.memref_slice %arg14[%20, %c0_i32_66] : memref<5000x32xf32, #tpu.memory_space<any>> -> memref<1x32xf32, #tpu.memory_space<any>>
    %c4_i32_67 = arith.constant 4 : i32
    %c0_i32_68 = arith.constant 0 : i32
    %97 = tpu.memref_slice %arg19[%c4_i32_67, %c0_i32_68] : memref<8x32xf32, #tpu.memory_space<vmem>> -> memref<1x32xf32, #tpu.memory_space<vmem>>
    %98 = tpu.memref_slice %arg20[%c4_i32_65] : memref<8x!tpu.dma_semaphore, #tpu.memory_space<semaphore_mem>> -> memref<1x!tpu.dma_semaphore, #tpu.memory_space<semaphore_mem>>
    %99 = tpu.memref_squeeze %98 : memref<1x!tpu.dma_semaphore, #tpu.memory_space<semaphore_mem>> -> memref<!tpu.dma_semaphore, #tpu.memory_space<semaphore_mem>>
    tpu.wait_dma2 semaphore(%99 : memref<!tpu.dma_semaphore, #tpu.memory_space<semaphore_mem>>) src(%96 : memref<1x32xf32, #tpu.memory_space<any>>) dst(%97 : memref<1x32xf32, #tpu.memory_space<vmem>>)
    %c5_i32_69 = arith.constant 5 : i32
    %c0_i32_70 = arith.constant 0 : i32
    %100 = tpu.memref_slice %arg14[%25, %c0_i32_70] : memref<5000x32xf32, #tpu.memory_space<any>> -> memref<1x32xf32, #tpu.memory_space<any>>
    %c5_i32_71 = arith.constant 5 : i32
    %c0_i32_72 = arith.constant 0 : i32
    %101 = tpu.memref_slice %arg19[%c5_i32_71, %c0_i32_72] : memref<8x32xf32, #tpu.memory_space<vmem>> -> memref<1x32xf32, #tpu.memory_space<vmem>>
    %102 = tpu.memref_slice %arg20[%c5_i32_69] : memref<8x!tpu.dma_semaphore, #tpu.memory_space<semaphore_mem>> -> memref<1x!tpu.dma_semaphore, #tpu.memory_space<semaphore_mem>>
    %103 = tpu.memref_squeeze %102 : memref<1x!tpu.dma_semaphore, #tpu.memory_space<semaphore_mem>> -> memref<!tpu.dma_semaphore, #tpu.memory_space<semaphore_mem>>
    tpu.wait_dma2 semaphore(%103 : memref<!tpu.dma_semaphore, #tpu.memory_space<semaphore_mem>>) src(%100 : memref<1x32xf32, #tpu.memory_space<any>>) dst(%101 : memref<1x32xf32, #tpu.memory_space<vmem>>)
    %c6_i32_73 = arith.constant 6 : i32
    %c0_i32_74 = arith.constant 0 : i32
    %104 = tpu.memref_slice %arg14[%30, %c0_i32_74] : memref<5000x32xf32, #tpu.memory_space<any>> -> memref<1x32xf32, #tpu.memory_space<any>>
    %c6_i32_75 = arith.constant 6 : i32
    %c0_i32_76 = arith.constant 0 : i32
    %105 = tpu.memref_slice %arg19[%c6_i32_75, %c0_i32_76] : memref<8x32xf32, #tpu.memory_space<vmem>> -> memref<1x32xf32, #tpu.memory_space<vmem>>
    %106 = tpu.memref_slice %arg20[%c6_i32_73] : memref<8x!tpu.dma_semaphore, #tpu.memory_space<semaphore_mem>> -> memref<1x!tpu.dma_semaphore, #tpu.memory_space<semaphore_mem>>
    %107 = tpu.memref_squeeze %106 : memref<1x!tpu.dma_semaphore, #tpu.memory_space<semaphore_mem>> -> memref<!tpu.dma_semaphore, #tpu.memory_space<semaphore_mem>>
    tpu.wait_dma2 semaphore(%107 : memref<!tpu.dma_semaphore, #tpu.memory_space<semaphore_mem>>) src(%104 : memref<1x32xf32, #tpu.memory_space<any>>) dst(%105 : memref<1x32xf32, #tpu.memory_space<vmem>>)
    %c7_i32_77 = arith.constant 7 : i32
    %c0_i32_78 = arith.constant 0 : i32
    %108 = tpu.memref_slice %arg14[%35, %c0_i32_78] : memref<5000x32xf32, #tpu.memory_space<any>> -> memref<1x32xf32, #tpu.memory_space<any>>
    %c7_i32_79 = arith.constant 7 : i32
    %c0_i32_80 = arith.constant 0 : i32
    %109 = tpu.memref_slice %arg19[%c7_i32_79, %c0_i32_80] : memref<8x32xf32, #tpu.memory_space<vmem>> -> memref<1x32xf32, #tpu.memory_space<vmem>>
    %110 = tpu.memref_slice %arg20[%c7_i32_77] : memref<8x!tpu.dma_semaphore, #tpu.memory_space<semaphore_mem>> -> memref<1x!tpu.dma_semaphore, #tpu.memory_space<semaphore_mem>>
    %111 = tpu.memref_squeeze %110 : memref<1x!tpu.dma_semaphore, #tpu.memory_space<semaphore_mem>> -> memref<!tpu.dma_semaphore, #tpu.memory_space<semaphore_mem>>
    tpu.wait_dma2 semaphore(%111 : memref<!tpu.dma_semaphore, #tpu.memory_space<semaphore_mem>>) src(%108 : memref<1x32xf32, #tpu.memory_space<any>>) dst(%109 : memref<1x32xf32, #tpu.memory_space<vmem>>)
    %c0_81 = arith.constant 0 : index
    %c0_82 = arith.constant 0 : index
    %112 = vector.load %arg19[%c0_81, %c0_82] : memref<8x32xf32, #tpu.memory_space<vmem>>, vector<8x32xf32>
    %c0_83 = arith.constant 0 : index
    %c0_84 = arith.constant 0 : index
    %113 = vector.load %arg18[%c0_83, %c0_84] : memref<8x32xf32, #tpu.memory_space<vmem>>, vector<8x32xf32>
    tpu.vector_store %arg18[%c0_83, %c0_84], %112 {strides = array<i32>} : memref<8x32xf32, #tpu.memory_space<vmem>>, vector<8x32xf32>,
    %114 = arith.truncf %112 : vector<8x32xf32> to vector<8x32xbf16>
    %c0_85 = arith.constant 0 : index
    %c0_86 = arith.constant 0 : index
    %c0_87 = arith.constant 0 : index
    %115 = vector.load %arg9[%c0_85, %c0_86, %c0_87] : memref<3x32x32xbf16, #tpu.memory_space<vmem>>, vector<1x32x32xbf16>
    %116 = vector.shape_cast %115 : vector<1x32x32xbf16> to vector<32x32xbf16>
    %cst_88 = arith.constant dense<0.000000e+00> : vector<8x32xf32>
    %117 = tpu.matmul %114, %116, %cst_88 {dimension_numbers = #tpu.dot_dimension_numbers<[1], [0], [0], [1], [0, 0, 1, 1], [], []>} : vector<8x32xbf16>, vector<32x32xbf16>, vector<8x32xf32> -> vector<8x32xf32>
    %c0_89 = arith.constant 0 : index
    %c0_90 = arith.constant 0 : index
    %c0_91 = arith.constant 0 : index
    %118 = vector.load %arg10[%c0_89, %c0_90, %c0_91] : memref<3x32x32xbf16, #tpu.memory_space<vmem>>, vector<1x32x32xbf16>
    %119 = vector.shape_cast %118 : vector<1x32x32xbf16> to vector<32x32xbf16>
    %cst_92 = arith.constant dense<0.000000e+00> : vector<8x32xf32>
    %120 = tpu.matmul %79, %119, %cst_92 {dimension_numbers = #tpu.dot_dimension_numbers<[1], [0], [0], [1], [0, 0, 1, 1], [], []>} : vector<8x32xbf16>, vector<32x32xbf16>, vector<8x32xf32> -> vector<8x32xf32>
    %121 = arith.addf %117, %120 : vector<8x32xf32>
    %c0_93 = arith.constant 0 : index
    %c0_94 = arith.constant 0 : index
    %c0_95 = arith.constant 0 : index
    %122 = vector.load %arg12[%c0_93, %c0_94, %c0_95] : memref<3x1x32xf32, #tpu.memory_space<vmem>>, vector<1x1x32xf32>
    %123 = vector.shape_cast %122 : vector<1x1x32xf32> to vector<1x32xf32>
    %124 = vector.broadcast %123 : vector<1x32xf32> to vector<8x32xf32>
    %125 = arith.addf %121, %124 : vector<8x32xf32>
    %c0_96 = arith.constant 0 : index
    %c0_97 = arith.constant 0 : index
    %c0_98 = arith.constant 0 : index
    %126 = vector.load %arg11[%c0_96, %c0_97, %c0_98] : memref<3x32x32xbf16, #tpu.memory_space<vmem>>, vector<1x32x32xbf16>
    %127 = vector.shape_cast %126 : vector<1x32x32xbf16> to vector<32x32xbf16>
    %cst_99 = arith.constant dense<0.000000e+00> : vector<8x32xf32>
    %128 = tpu.matmul %41, %127, %cst_99 {dimension_numbers = #tpu.dot_dimension_numbers<[1], [0], [0], [1], [0, 0, 1, 1], [], []>} : vector<8x32xbf16>, vector<32x32xbf16>, vector<8x32xf32> -> vector<8x32xf32>
    %c0_100 = arith.constant 0 : index
    %c0_101 = arith.constant 0 : index
    %c0_102 = arith.constant 0 : index
    %129 = vector.load %arg13[%c0_100, %c0_101, %c0_102] : memref<3x1x32xf32, #tpu.memory_space<vmem>>, vector<1x1x32xf32>
    %130 = vector.shape_cast %129 : vector<1x1x32xf32> to vector<1x32xf32>
    %131 = vector.broadcast %130 : vector<1x32xf32> to vector<8x32xf32>
    %132 = arith.addf %128, %131 : vector<8x32xf32>
    %133 = arith.addf %125, %132 : vector<8x32xf32>
    %134 = arith.negf %133 : vector<8x32xf32>
    %135 = math.exp %134 : vector<8x32xf32>
    %cst_103 = arith.constant 1.000000e+00 : f32
    %136 = vector.broadcast %cst_103 : f32 to vector<8x32xf32>
    %137 = arith.addf %136, %135 : vector<8x32xf32>
    %138 = arith.divf %136, %137 : vector<8x32xf32>
    %c1_104 = arith.constant 1 : index
    %c0_105 = arith.constant 0 : index
    %c0_106 = arith.constant 0 : index
    %139 = vector.load %arg9[%c1_104, %c0_105, %c0_106] : memref<3x32x32xbf16, #tpu.memory_space<vmem>>, vector<1x32x32xbf16>
    %140 = vector.shape_cast %139 : vector<1x32x32xbf16> to vector<32x32xbf16>
    %cst_107 = arith.constant dense<0.000000e+00> : vector<8x32xf32>
    %141 = tpu.matmul %114, %140, %cst_107 {dimension_numbers = #tpu.dot_dimension_numbers<[1], [0], [0], [1], [0, 0, 1, 1], [], []>} : vector<8x32xbf16>, vector<32x32xbf16>, vector<8x32xf32> -> vector<8x32xf32>
    %c1_108 = arith.constant 1 : index
    %c0_109 = arith.constant 0 : index
    %c0_110 = arith.constant 0 : index
    %142 = vector.load %arg10[%c1_108, %c0_109, %c0_110] : memref<3x32x32xbf16, #tpu.memory_space<vmem>>, vector<1x32x32xbf16>
    %143 = vector.shape_cast %142 : vector<1x32x32xbf16> to vector<32x32xbf16>
    %cst_111 = arith.constant dense<0.000000e+00> : vector<8x32xf32>
    %144 = tpu.matmul %79, %143, %cst_111 {dimension_numbers = #tpu.dot_dimension_numbers<[1], [0], [0], [1], [0, 0, 1, 1], [], []>} : vector<8x32xbf16>, vector<32x32xbf16>, vector<8x32xf32> -> vector<8x32xf32>
    %145 = arith.addf %141, %144 : vector<8x32xf32>
    %c1_112 = arith.constant 1 : index
    %c0_113 = arith.constant 0 : index
    %c0_114 = arith.constant 0 : index
    %146 = vector.load %arg12[%c1_112, %c0_113, %c0_114] : memref<3x1x32xf32, #tpu.memory_space<vmem>>, vector<1x1x32xf32>
    %147 = vector.shape_cast %146 : vector<1x1x32xf32> to vector<1x32xf32>
    %148 = vector.broadcast %147 : vector<1x32xf32> to vector<8x32xf32>
    %149 = arith.addf %145, %148 : vector<8x32xf32>
    %c1_115 = arith.constant 1 : index
    %c0_116 = arith.constant 0 : index
    %c0_117 = arith.constant 0 : index
    %150 = vector.load %arg11[%c1_115, %c0_116, %c0_117] : memref<3x32x32xbf16, #tpu.memory_space<vmem>>, vector<1x32x32xbf16>
    %151 = vector.shape_cast %150 : vector<1x32x32xbf16> to vector<32x32xbf16>
    %cst_118 = arith.constant dense<0.000000e+00> : vector<8x32xf32>
    %152 = tpu.matmul %41, %151, %cst_118 {dimension_numbers = #tpu.dot_dimension_numbers<[1], [0], [0], [1], [0, 0, 1, 1], [], []>} : vector<8x32xbf16>, vector<32x32xbf16>, vector<8x32xf32> -> vector<8x32xf32>
    %c1_119 = arith.constant 1 : index
    %c0_120 = arith.constant 0 : index
    %c0_121 = arith.constant 0 : index
    %153 = vector.load %arg13[%c1_119, %c0_120, %c0_121] : memref<3x1x32xf32, #tpu.memory_space<vmem>>, vector<1x1x32xf32>
    %154 = vector.shape_cast %153 : vector<1x1x32xf32> to vector<1x32xf32>
    %155 = vector.broadcast %154 : vector<1x32xf32> to vector<8x32xf32>
    %156 = arith.addf %152, %155 : vector<8x32xf32>
    %157 = arith.addf %149, %156 : vector<8x32xf32>
    %158 = arith.negf %157 : vector<8x32xf32>
    %159 = math.exp %158 : vector<8x32xf32>
    %cst_122 = arith.constant 1.000000e+00 : f32
    %160 = vector.broadcast %cst_122 : f32 to vector<8x32xf32>
    %161 = arith.addf %160, %159 : vector<8x32xf32>
    %162 = arith.divf %160, %161 : vector<8x32xf32>
    %c2_123 = arith.constant 2 : index
    %c0_124 = arith.constant 0 : index
    %c0_125 = arith.constant 0 : index
    %163 = vector.load %arg9[%c2_123, %c0_124, %c0_125] : memref<3x32x32xbf16, #tpu.memory_space<vmem>>, vector<1x32x32xbf16>
    %164 = vector.shape_cast %163 : vector<1x32x32xbf16> to vector<32x32xbf16>
    %cst_126 = arith.constant dense<0.000000e+00> : vector<8x32xf32>
    %165 = tpu.matmul %114, %164, %cst_126 {dimension_numbers = #tpu.dot_dimension_numbers<[1], [0], [0], [1], [0, 0, 1, 1], [], []>} : vector<8x32xbf16>, vector<32x32xbf16>, vector<8x32xf32> -> vector<8x32xf32>
    %c2_127 = arith.constant 2 : index
    %c0_128 = arith.constant 0 : index
    %c0_129 = arith.constant 0 : index
    %166 = vector.load %arg10[%c2_127, %c0_128, %c0_129] : memref<3x32x32xbf16, #tpu.memory_space<vmem>>, vector<1x32x32xbf16>
    %167 = vector.shape_cast %166 : vector<1x32x32xbf16> to vector<32x32xbf16>
    %cst_130 = arith.constant dense<0.000000e+00> : vector<8x32xf32>
    %168 = tpu.matmul %79, %167, %cst_130 {dimension_numbers = #tpu.dot_dimension_numbers<[1], [0], [0], [1], [0, 0, 1, 1], [], []>} : vector<8x32xbf16>, vector<32x32xbf16>, vector<8x32xf32> -> vector<8x32xf32>
    %169 = arith.addf %165, %168 : vector<8x32xf32>
    %c2_131 = arith.constant 2 : index
    %c0_132 = arith.constant 0 : index
    %c0_133 = arith.constant 0 : index
    %170 = vector.load %arg12[%c2_131, %c0_132, %c0_133] : memref<3x1x32xf32, #tpu.memory_space<vmem>>, vector<1x1x32xf32>
    %171 = vector.shape_cast %170 : vector<1x1x32xf32> to vector<1x32xf32>
    %172 = vector.broadcast %171 : vector<1x32xf32> to vector<8x32xf32>
    %173 = arith.addf %169, %172 : vector<8x32xf32>
    %c2_134 = arith.constant 2 : index
    %c0_135 = arith.constant 0 : index
    %c0_136 = arith.constant 0 : index
    %174 = vector.load %arg11[%c2_134, %c0_135, %c0_136] : memref<3x32x32xbf16, #tpu.memory_space<vmem>>, vector<1x32x32xbf16>
    %175 = vector.shape_cast %174 : vector<1x32x32xbf16> to vector<32x32xbf16>
    %cst_137 = arith.constant dense<0.000000e+00> : vector<8x32xf32>
    %176 = tpu.matmul %41, %175, %cst_137 {dimension_numbers = #tpu.dot_dimension_numbers<[1], [0], [0], [1], [0, 0, 1, 1], [], []>} : vector<8x32xbf16>, vector<32x32xbf16>, vector<8x32xf32> -> vector<8x32xf32>
    %c2_138 = arith.constant 2 : index
    %c0_139 = arith.constant 0 : index
    %c0_140 = arith.constant 0 : index
    %177 = vector.load %arg13[%c2_138, %c0_139, %c0_140] : memref<3x1x32xf32, #tpu.memory_space<vmem>>, vector<1x1x32xf32>
    %178 = vector.shape_cast %177 : vector<1x1x32xf32> to vector<1x32xf32>
    %179 = vector.broadcast %178 : vector<1x32xf32> to vector<8x32xf32>
    %180 = arith.addf %176, %179 : vector<8x32xf32>
    %181 = arith.mulf %138, %180 : vector<8x32xf32>
    %182 = arith.addf %173, %181 : vector<8x32xf32>
    %183 = math.tanh %182 : vector<8x32xf32>
    %cst_141 = arith.constant 1.000000e+00 : f32
    %184 = vector.broadcast %cst_141 : f32 to vector<8x32xf32>
    %185 = arith.subf %184, %162 : vector<8x32xf32>
    %186 = arith.mulf %185, %183 : vector<8x32xf32>
    %187 = arith.mulf %162, %40 : vector<8x32xf32>
    %188 = arith.addf %186, %187 : vector<8x32xf32>
    %c0_142 = arith.constant 0 : index
    %c0_143 = arith.constant 0 : index
    %189 = vector.load %arg15[%c0_142, %c0_143] : memref<8x32xf32, #tpu.memory_space<vmem>>, vector<8x32xf32>
    tpu.vector_store %arg15[%c0_142, %c0_143], %188 {strides = array<i32>} : memref<8x32xf32, #tpu.memory_space<vmem>>, vector<8x32xf32>,
    return
  }
  func.func @transform_0(%arg0: i32, %arg1: memref<8xi32, #tpu.memory_space<smem>>) -> (i32, i32) {
    %c0_i32 = arith.constant 0 : i32
    %c0_i32_0 = arith.constant 0 : i32
    %c0_i32_1 = arith.constant 0 : i32
    return %c0_i32, %c0_i32_0 : i32, i32
  }
  func.func @transform_1(%arg0: i32, %arg1: memref<8xi32, #tpu.memory_space<smem>>) -> (i32, i32, i32) {
    %c0_i32 = arith.constant 0 : i32
    %c0_i32_0 = arith.constant 0 : i32
    %c0_i32_1 = arith.constant 0 : i32
    %c0_i32_2 = arith.constant 0 : i32
    return %c0_i32, %c0_i32_0, %c0_i32_1 : i32, i32, i32
  }
  func.func @transform_2(%arg0: i32, %arg1: memref<8xi32, #tpu.memory_space<smem>>) -> (i32, i32) {
    %c0_i32 = arith.constant 0 : i32
    %c0_i32_0 = arith.constant 0 : i32
    %c0_i32_1 = arith.constant 0 : i32
    return %c0_i32, %c0_i32_0 : i32, i32
  }
  func.func @transform_3(%arg0: i32, %arg1: memref<8xi32, #tpu.memory_space<smem>>) -> (i32, i32) {
    %c0_i32 = arith.constant 0 : i32
    %c0_i32_0 = arith.constant 0 : i32
    %c0_i32_1 = arith.constant 0 : i32
    return %c0_i32, %c0_i32_0 : i32, i32
  }
  func.func @transform_4(%arg0: i32, %arg1: memref<8xi32, #tpu.memory_space<smem>>) -> (i32, i32, i32) {
    %c0_i32 = arith.constant 0 : i32
    %c0_i32_0 = arith.constant 0 : i32
    %c0_i32_1 = arith.constant 0 : i32
    %c0_i32_2 = arith.constant 0 : i32
    return %c0_i32, %c0_i32_0, %c0_i32_1 : i32, i32, i32
  }
  func.func @transform_5(%arg0: i32, %arg1: memref<8xi32, #tpu.memory_space<smem>>) -> (i32, i32) {
    %c0_i32 = arith.constant 0 : i32
    %c0_i32_0 = arith.constant 0 : i32
    %c0_i32_1 = arith.constant 0 : i32
    return %c0_i32, %c0_i32_0 : i32, i32
  }
  func.func @transform_6(%arg0: i32, %arg1: memref<8xi32, #tpu.memory_space<smem>>) -> (i32, i32) {
    %c0_i32 = arith.constant 0 : i32
    %c0_i32_0 = arith.constant 0 : i32
    %c0_i32_1 = arith.constant 0 : i32
    return %c0_i32, %c0_i32_0 : i32, i32
  }
  func.func @transform_7(%arg0: i32, %arg1: memref<8xi32, #tpu.memory_space<smem>>) -> (i32, i32, i32) {
    %c0_i32 = arith.constant 0 : i32
    %c0_i32_0 = arith.constant 0 : i32
    %c0_i32_1 = arith.constant 0 : i32
    %c0_i32_2 = arith.constant 0 : i32
    return %c0_i32, %c0_i32_0, %c0_i32_1 : i32, i32, i32
  }
  func.func @transform_8(%arg0: i32, %arg1: memref<8xi32, #tpu.memory_space<smem>>) -> (i32, i32, i32) {
    %c0_i32 = arith.constant 0 : i32
    %c0_i32_0 = arith.constant 0 : i32
    %c0_i32_1 = arith.constant 0 : i32
    %c0_i32_2 = arith.constant 0 : i32
    return %c0_i32, %c0_i32_0, %c0_i32_1 : i32, i32, i32
  }
  func.func @transform_9(%arg0: i32, %arg1: memref<8xi32, #tpu.memory_space<smem>>) -> (i32, i32, i32) {
    %c0_i32 = arith.constant 0 : i32
    %c0_i32_0 = arith.constant 0 : i32
    %c0_i32_1 = arith.constant 0 : i32
    %c0_i32_2 = arith.constant 0 : i32
    return %c0_i32, %c0_i32_0, %c0_i32_1 : i32, i32, i32
  }
  func.func @transform_10(%arg0: i32, %arg1: memref<8xi32, #tpu.memory_space<smem>>) -> (i32, i32, i32) {
    %c0_i32 = arith.constant 0 : i32
    %c0_i32_0 = arith.constant 0 : i32
    %c0_i32_1 = arith.constant 0 : i32
    %c0_i32_2 = arith.constant 0 : i32
    return %c0_i32, %c0_i32_0, %c0_i32_1 : i32, i32, i32
  }
  func.func @transform_11(%arg0: i32, %arg1: memref<8xi32, #tpu.memory_space<smem>>) -> (i32, i32, i32) {
    %c0_i32 = arith.constant 0 : i32
    %c0_i32_0 = arith.constant 0 : i32
    %c0_i32_1 = arith.constant 0 : i32
    %c0_i32_2 = arith.constant 0 : i32
    return %c0_i32, %c0_i32_0, %c0_i32_1 : i32, i32, i32
  }
  func.func @transform_13(%arg0: i32, %arg1: memref<8xi32, #tpu.memory_space<smem>>) -> (i32, i32) {
    %c0_i32 = arith.constant 0 : i32
    %c0_i32_0 = arith.constant 0 : i32
    %c0_i32_1 = arith.constant 0 : i32
    return %c0_i32, %c0_i32_0 : i32, i32
  }
  func.func @transform_14(%arg0: i32, %arg1: memref<8xi32, #tpu.memory_space<smem>>) -> (i32, i32) {
    %c0_i32 = arith.constant 0 : i32
    %c0_i32_0 = arith.constant 0 : i32
    %c0_i32_1 = arith.constant 0 : i32
    return %c0_i32, %c0_i32_0 : i32, i32
  }
  func.func @transform_15(%arg0: i32, %arg1: memref<8xi32, #tpu.memory_space<smem>>) -> (i32, i32) {
    %c0_i32 = arith.constant 0 : i32
    %c0_i32_0 = arith.constant 0 : i32
    %c0_i32_1 = arith.constant 0 : i32
    return %c0_i32, %c0_i32_0 : i32, i32
  }
  func.func @transform_16(%arg0: i32, %arg1: memref<8xi32, #tpu.memory_space<smem>>) -> (i32, i32) {
    %c0_i32 = arith.constant 0 : i32
    %c0_i32_0 = arith.constant 0 : i32
    %c0_i32_1 = arith.constant 0 : i32
    return %c0_i32, %c0_i32_0 : i32, i32
  }
}

</mosaic_0001>

<bundles_post_ra>
// kernel: tpu_custom_call.1
= control target key start
LH: loop header
LB: loop body
LE: loop exit
PB: predicated region body
PF: predicated region fallthrough
CT: control target
= control target key end

     0   :  { %s4421_s0 = inlined_call_operand.vmem [shape: s32[8], index: 0, kind: input, shape index: {}]   ;;  %s4422_s1 = inlined_call_operand.vmem [shape: f32[8,32], index: 1, kind: input, shape index: {}]   ;;  %s4423_s2 = inlined_call_operand.vmem [shape: f32[8,16,32], index: 2, kind: input, shape index: {}]   ;;  %s4424_s3 = inlined_call_operand.vmem [shape: f32[8,16], index: 3, kind: input, shape index: {}]   ;;  %s4425_s4 = inlined_call_operand.vmem [shape: bf16[32,32], index: 4, kind: input, shape index: {}]   ;;  %s4426_s5 = inlined_call_operand.vmem [shape: bf16[8,32,32], index: 5, kind: input, shape index: {}]   ;;  %s4427_s6 = inlined_call_operand.vmem [shape: f32[1,32], index: 6, kind: input, shape index: {}]   ;;  %s4428_s7 = inlined_call_operand.vmem [shape: f32[1,32], index: 7, kind: input, shape index: {}]   ;;  %s4429_s8 = inlined_call_operand.vmem [shape: bf16[3,32,32], index: 8, kind: input, shape index: {}]   ;;  %s4430_s9 = inlined_call_operand.vmem [shape: bf16[3,32,32], index: 9, kind: input, shape index: {}]   ;;  %s4431_s10 = inlined_call_operand.vmem [shape: bf16[3,32,32], index: 10, kind: input, shape index: {}]   ;;  %s4432_s11 = inlined_call_operand.vmem [shape: f32[3,1,32], index: 11, kind: input, shape index: {}]   ;;  %s4433_s12 = inlined_call_operand.vmem [shape: f32[3,1,32], index: 12, kind: input, shape index: {}]   ;;  %s4434_s13 = inlined_call_operand.vmem [shape: f32[5000,32], index: 13, kind: input, shape index: {}]   ;;  %s4435_s14 = inlined_call_operand.hbm [shape: f32[8,32], index: 14, kind: output, shape index: {0}]   ;;  %s4436_s15 = inlined_call_operand.hbm [shape: f32[8,16], index: 15, kind: output, shape index: {1}]   ;;  %s4437_s16 = inlined_call_operand.hbm [shape: f32[8,32], index: 16, kind: output, shape index: {2}]   ;;  %s4438_s17 = inlined_call_operand.hbm [shape: f32[8,32], index: 17, kind: output, shape index: {3}]  }
   0x1   :  { %4440 = sst [smem:[#allocation33_spill]] %s4421_s0 }
   0x2   :  { %4441 = sst [smem:[#allocation34_spill]] %s4422_s1 }
   0x3   :  { %4442 = sst [smem:[#allocation35_spill]] %s4432_s11 }
   0x4   :  { %s4443_s26 = sld [smem:[#allocation33_spill]] }
   0xa   :  { %s23_s11 = sshll.u32 %s4443_s26, 4  ;;  %s24_s11 = int_to_ptr.vmem [resolvable:$true] %s23_s11 }
   0xb   :  { %s3366_s27 = scalar_lea.vmem %s24_s11, 16  ;;  %p3371_p1 = scmp.lt.s32.totalorder %s24_s11, %s24_s11 }
   0xc   :  { %p3367_p0 = scmp.ne.s32.totalorder %s24_s11, %s3366_s27  ;;  %p3372_p2 = scmp.lt.s32.totalorder %s3366_s27, %s3366_s27 }
   0xe   :  { %p3373_p3 = por %p3372_p2, %p3371_p1 }
  0x10   :  { %p3374_p4 = pnand %p3373_p3, %p3367_p0 }
  0x12   :  { %3377 = shalt.err (!%p3374_p4)  }
  0x13   :  { %s3482_s28 = smov [#allocation5]  }
  0x14   :  { %26 = dma.vmem_to_smem %s24_s11, 16, %s3482_s28, [#allocation4] }
  0x15   :  { %3458 = dma.done.wait [#allocation4], 16 }
  0x16   :  { %3459 = vsyncadd [#allocation4], 4294967280 }
  0x17   :  { %28 = sfence }
  0x18   :  { %29 = vsyncpa [#allocation7], 0 }
  0x19   :  { %30 = vsyncpa [#allocation9], 0 }
  0x1a   :  { %31 = vsyncpa [#allocation12], 0  ;;  %s57_s29 = sld [smem:[#allocation5]] }
  0x20   :  { %s58_s18 = scalar_lea.vmem %s4434_s13, %s57_s29 }
  0x21   :  { %v77_v0 = vld [vmem:[%s58_s18] sm:$0x1] }
  0x22   :  { %78 = vst [vmem:[#allocation2] sm:$0x1] %v77_v0 }
  0x23   :  { %104 = vsyncadd [#allocation3], 16  ;;  %s2922_s19 = sld [smem:[#allocation5 + $0x1]] }
  0x29   :  { %s106_s21 = scalar_lea.vmem %s4434_s13, %s2922_s19 }
  0x2a   :  { %v127_v1 = vld [vmem:[%s106_s21] sm:$0x1] }
  0x2b   :  { %128 = vst [vmem:[#allocation2 + $0x1] sm:$0x1] %v127_v1 }
  0x2c   :  { %154 = vsyncadd [#allocation3 + $0x1], 16  ;;  %s2923_s11 = sld [smem:[#allocation5 + $0x2]] }
  0x32   :  { %s156_s24 = scalar_lea.vmem %s4434_s13, %s2923_s11 }
  0x33   :  { %v177_v2 = vld [vmem:[%s156_s24] sm:$0x1] }
  0x34   :  { %178 = vst [vmem:[#allocation2 + $0x2] sm:$0x1] %v177_v2 }
  0x35   :  { %204 = vsyncadd [#allocation3 + $0x2], 16  ;;  %s2924_s25 = sld [smem:[#allocation5 + $0x3]] }
  0x3b   :  { %s206_s28 = scalar_lea.vmem %s4434_s13, %s2924_s25 }
  0x3c   :  { %v227_v3 = vld [vmem:[%s206_s28] sm:$0x1] }
  0x3d   :  { %228 = vst [vmem:[#allocation2 + $0x3] sm:$0x1] %v227_v3 }
  0x3e   :  { %254 = vsyncadd [#allocation3 + $0x3], 16  ;;  %s2925_s29 = sld [smem:[#allocation5 + $0x4]] }
  0x44   :  { %s256_s18 = scalar_lea.vmem %s4434_s13, %s2925_s29 }
  0x45   :  { %v277_v4 = vld [vmem:[%s256_s18] sm:$0x1] }
  0x46   :  { %278 = vst [vmem:[#allocation2 + $0x4] sm:$0x1] %v277_v4 }
  0x47   :  { %304 = vsyncadd [#allocation3 + $0x4], 16  ;;  %s2926_s19 = sld [smem:[#allocation5 + $0x5]] }
  0x4d   :  { %s306_s21 = scalar_lea.vmem %s4434_s13, %s2926_s19 }
  0x4e   :  { %v327_v5 = vld [vmem:[%s306_s21] sm:$0x1] }
  0x4f   :  { %328 = vst [vmem:[#allocation2 + $0x5] sm:$0x1] %v327_v5 }
  0x50   :  { %354 = vsyncadd [#allocation3 + $0x5], 16  ;;  %s2927_s11 = sld [smem:[#allocation5 + $0x6]] }
  0x56   :  { %s356_s24 = scalar_lea.vmem %s4434_s13, %s2927_s11 }
  0x57   :  { %v377_v6 = vld [vmem:[%s356_s24] sm:$0x1] }
  0x58   :  { %378 = vst [vmem:[#allocation2 + $0x6] sm:$0x1] %v377_v6 }
  0x59   :  { %404 = vsyncadd [#allocation3 + $0x6], 16  ;;  %s2928_s25 = sld [smem:[#allocation5 + $0x7]] }
  0x5f   :  { %s406_s28 = scalar_lea.vmem %s4434_s13, %s2928_s25 }
  0x60   :  { %v427_v7 = vld [vmem:[%s406_s28] sm:$0x1] }
  0x61   :  { %428 = vst [vmem:[#allocation2 + $0x7] sm:$0x1] %v427_v7 }
  0x62   :  { %454 = vsyncadd [#allocation3 + $0x7], 16  ;;  %v3238_v8 = vld [vmem:[%s4425_s4 + $0x8] sm:$0xff]   ;;  %v3483_v9 = vmov 0.0   ;;  %v3240_v11 = vld [vmem:[%s4425_s4] sm:$0xff]   ;;  %vm3484_vm0 = vmmov 0   ;;  %v1026_v27 = vlaneseq }
  0x63   :  { %3083 = vmatprep.subr.bf16.mxu0 %v3483_v9  ;;  %3091 = vmatprep.subr.bf16.mxu1 %v3483_v9  ;;  %v3239_v10 = vld [vmem:[%s4426_s5 + $0x8] sm:$0xff]   ;;  %v3241_v12 = vld [vmem:[%s4426_s5] sm:$0xff]   ;;  %s4444_s22 = sld [smem:[#allocation34_spill]]  ;;  %vm489_vm1 = vcmask 261120   ;;  %v3242_v17 = vld [vmem:[%s4426_s5 + $0x18] sm:$0xff]   ;;  %vm1434_vm2 = vcmask 130112  }
  0x64   :  { %3084 = vmatpush3.bf16.msra.mxu0 %v3238_v8  ;;  %3087 = vmatprep.mubr.msk.bf16.mxu0 %vm3484_vm0, %v3483_v9  ;;  %v457_v14 = vld [vmem:[%s4423_s2] sm:$0xff]  ;;  %v458_v16 = vld [vmem:[%s4423_s2 + $0x8] sm:$0xff]  ;;  %v3244_v20 = vld [vmem:[%s4426_s5 + $0x10] sm:$0xff]   ;;  %v3694_v33 = vshrl.u32 %v1026_v27, 7  ;;  %v3485_v6 = vmov 1966171168  }
  0x65   :  { %3085 = vmatprep.subr.bf16.mxu0 %v3483_v9  ;;  %3092 = vmatpush3.bf16.msra.mxu1 %v3239_v10  ;;  %v533_v18 = vpack.c.bf16 %v458_v16, %v457_v14  ;;  %v3243_v19 = vld [vmem:[%s4426_s5 + $0x28] sm:$0xff]   ;;  %v3245_v21 = vld [vmem:[%s4426_s5 + $0x20] sm:$0xff]   ;;  %v459_v22 = vld [vmem:[%s4423_s2 + $0x10] sm:$0xff]  ;;  %v1024_v7 = vunpack.c.l.s4 %v3485_v6  ;;  %vm1499_vm3 = vcmask 1041409   ;;  %vm1501_vm4 = vcmask 1042434  }
  0x66   :  { %3095 = vmatprep.mubr.msk.bf16.mxu1 %vm3484_vm0, %v3483_v9  ;;  %3093 = vmatprep.subr.bf16.mxu1 %v3483_v9  ;;  %v460_v23 = vld [vmem:[%s4423_s2 + $0x18] sm:$0xff]  ;;  %v461_v24 = vld [vmem:[%s4423_s2 + $0x20] sm:$0xff]  ;;  %v462_v25 = vld [vmem:[%s4423_s2 + $0x28] sm:$0xff]  ;;  %v3716_v39 = vsub.s32 0, %v3694_v33  ;;  %v3735_v45 = vsub.s32 1, %v3694_v33  ;;  %v3768_v55 = vsub.s32 2, %v3694_v33 }
  0x67   :  { %v534_v26 = vpack.c.bf16 %v460_v23, %v459_v22  ;;  %v3246_v28 = vld [vmem:[%s4426_s5 + $0x38] sm:$0xff]   ;;  %v535_v29 = vpack.c.bf16 %v462_v25, %v461_v24  ;;  %v3247_v30 = vld [vmem:[%s4426_s5 + $0x48] sm:$0xff]   ;;  %v3248_v31 = vld [vmem:[%s4426_s5 + $0x30] sm:$0xff]   ;;  %v3786_v61 = vsub.s32 3, %v3694_v33  ;;  %v3793_v0 = vsub.s32 4, %v3694_v33 }
  0x68   :  { %3086 = vmatpush3.bf16.msra.mxu0 %v3240_v11  ;;  %v463_v32 = vld [vmem:[%s4423_s2 + $0x30] sm:$0xff]  ;;  %v464_v34 = vld [vmem:[%s4423_s2 + $0x38] sm:$0xff]  ;;  %v3249_v35 = vld [vmem:[%s4426_s5 + $0x40] sm:$0xff]   ;;  %v3799_v2 = vsub.s32 5, %v3694_v33  ;;  %v3804_v4 = vsub.s32 6, %v3694_v33  ;;  %v1025_v8 = vunpack.c.0.s8 %v1024_v7  ;;  %vm1503_vm5 = vcmask 1043459  }
  0x69   :  { %v3630_v13 = vld [vmem:[%s4444_s22] sm:$0xff]  ;;  %3099 = vmatprep.subr.bf16.mxu0 %v3483_v9  ;;  %3094 = vmatpush3.bf16.msra.mxu1 %v3241_v12  ;;  %v466_v37 = vld [vmem:[%s4423_s2 + $0x48] sm:$0xff]  ;;  %v536_v38 = vpack.c.bf16 %v464_v34, %v463_v32  ;;  %v3250_v40 = vld [vmem:[%s4426_s5 + $0x58] sm:$0xff]   ;;  %vm1505_vm6 = vcmask 1044484   ;;  %vm1507_vm7 = vcmask 1045509   ;;  %vm1509_vm8 = vcmask 1046534  }
  0x6a   :  { %v3638_v15 = vpack.c.bf16 %v3630_v13, %v3630_v13  ;;  %3107 = vmatprep.subr.bf16.mxu1 %v3483_v9  ;;  %v465_v36 = vld [vmem:[%s4423_s2 + $0x40] sm:$0xff]  ;;  %v3251_v42 = vld [vmem:[%s4426_s5 + $0x68] sm:$0xff]   ;;  %v3252_v46 = vld [vmem:[%s4426_s5 + $0x50] sm:$0xff]   ;;  %v1028_v10 = vsub.s32 %v1025_v8, %v3694_v33  ;;  %vm1511_vm9 = vcmask 1047559   ;;  %vm1514_vm10 = vcmask 130048  }
  0x6b   :  { %v537_v41 = vpack.c.bf16 %v466_v37, %v465_v36  ;;  %v3728_v43 = vld [vmem:[%s4424_s3] sm:$0xff]  ;;  %v467_v47 = vld [vmem:[%s4423_s2 + $0x50] sm:$0xff]  ;;  %v468_v48 = vld [vmem:[%s4423_s2 + $0x58] sm:$0xff] }
  0x6c   :  { %3088 = vmatmul.mubr.msk.bf16.vlgmr.msra.gmra.mxu0 %vm489_vm1, %v3638_v15  ;;  %3096 = vmatmul.mubr.msk.bf16.vlgmr.msra.gmra.mxu1 %vm489_vm1, %v533_v18  ;;  %v1242_v44 = vrot.slane %v3728_v43, %v3716_v39  ;;  %v3253_v49 = vld [vmem:[%s4426_s5 + $0x60] sm:$0xff]   ;;  %v470_v51 = vld [vmem:[%s4423_s2 + $0x68] sm:$0xff]  ;;  %v538_v52 = vpack.c.bf16 %v468_v48, %v467_v47  ;;  %v1253_v53 = vrot.slane %v3728_v43, %v3735_v45  ;;  %v3254_v54 = vld [vmem:[%s4426_s5 + $0x78] sm:$0xff]  }
  0x6d   :  { %3100 = vmatpush3.bf16.msra.mxu0 %v3242_v17  ;;  %3103 = vmatprep.mubr.msk.bf16.mxu0 %vm3484_vm0, %v3483_v9  ;;  %v469_v50 = vld [vmem:[%s4423_s2 + $0x60] sm:$0xff]  ;;  %v3255_v57 = vld [vmem:[%s4426_s5 + $0x70] sm:$0xff]   ;;  %v472_v59 = vld [vmem:[%s4423_s2 + $0x78] sm:$0xff]  ;;  %v1264_v60 = vrot.slane %v3728_v43, %v3768_v55  ;;  %v1275_v63 = vrot.slane %v3728_v43, %v3786_v61  ;;  %v1286_v1 = vrot.slane %v3728_v43, %v3793_v0 }
  0x6e   :  { %3101 = vmatprep.subr.bf16.mxu0 %v3483_v9  ;;  %3108 = vmatpush3.bf16.msra.mxu1 %v3243_v19  ;;  %v539_v56 = vpack.c.bf16 %v470_v51, %v469_v50  ;;  %v471_v58 = vld [vmem:[%s4423_s2 + $0x70] sm:$0xff]  ;;  %v1297_v3 = vrot.slane %v3728_v43, %v3799_v2  ;;  %v1308_v5 = vrot.slane %v3728_v43, %v3804_v4  ;;  %v3813_v25 = vld [vmem:[%s4427_s6] ss:$0 sm:$0xff] }
  0x6f   :  { %3111 = vmatprep.mubr.msk.bf16.mxu1 %vm3484_vm0, %v3483_v9  ;;  %3109 = vmatprep.subr.bf16.mxu1 %v3483_v9  ;;  %v540_v62 = vpack.c.bf16 %v472_v59, %v471_v58 }
  0x70   :  { %1248 = vbcast.lane.b32.xlu1 %v1242_v44, 264  ;;  %1244 = vbcast.lane.b32.xlu0 %v1242_v44, 256 }
  0x71   :  { %3102 = vmatpush3.bf16.msra.mxu0 %v3244_v20 }
  0x72   :  { %3115 = vmatprep.subr.bf16.mxu0 %v3483_v9  ;;  %3110 = vmatpush3.bf16.msra.mxu1 %v3245_v21 }
  0x73   :  { %3123 = vmatprep.subr.bf16.mxu1 %v3483_v9 }
  0x74   :  { %3104 = vmatmul.mubr.msk.bf16.vlgmr.msra.gmra.mxu0 %vm489_vm1, %v534_v26  ;;  %1255 = vbcast.lane.b32.xlu1 %v1253_v53, 256 }
  0x75   :  { %3116 = vmatpush3.bf16.msra.mxu0 %v3246_v28  ;;  %3119 = vmatprep.mubr.msk.bf16.mxu0 %vm3484_vm0, %v3483_v9 }
  0x76   :  { %3112 = vmatmul.mubr.msk.bf16.vlgmr.msra.gmra.mxu1 %vm489_vm1, %v535_v29  ;;  %3117 = vmatprep.subr.bf16.mxu0 %v3483_v9 }
  0x77   :  { %3124 = vmatpush3.bf16.msra.mxu1 %v3247_v30  ;;  %3127 = vmatprep.mubr.msk.bf16.mxu1 %vm3484_vm0, %v3483_v9 }
  0x78   :  { %3125 = vmatprep.subr.bf16.mxu1 %v3483_v9  ;;  %1266 = vbcast.lane.b32.xlu0 %v1264_v60, 256 }
  0x79   :  { %3118 = vmatpush3.bf16.msra.mxu0 %v3248_v31  ;;  %1259 = vbcast.lane.b32.xlu1 %v1253_v53, 264 }
  0x7a   :  { %3131 = vmatprep.subr.bf16.mxu0 %v3483_v9 }
  0x7b   :  { %3126 = vmatpush3.bf16.msra.mxu1 %v3249_v35 }
  0x7c   :  { %3120 = vmatmul.mubr.msk.bf16.vlgmr.msra.gmra.mxu0 %vm489_vm1, %v536_v38  ;;  %3139 = vmatprep.subr.bf16.mxu1 %v3483_v9 }
  0x7d   :  { %3132 = vmatpush3.bf16.msra.mxu0 %v3250_v40  ;;  %3135 = vmatprep.mubr.msk.bf16.mxu0 %vm3484_vm0, %v3483_v9 }
  0x7e   :  { %3128 = vmatmul.mubr.msk.bf16.vlgmr.msra.gmra.mxu1 %vm489_vm1, %v537_v41  ;;  %3133 = vmatprep.subr.bf16.mxu0 %v3483_v9 }
  0x7f   :  { %3140 = vmatpush3.bf16.msra.mxu1 %v3251_v42  ;;  %3143 = vmatprep.mubr.msk.bf16.mxu1 %vm3484_vm0, %v3483_v9 }
  0x80   :  { %3141 = vmatprep.subr.bf16.mxu1 %v3483_v9  ;;  %1277 = vbcast.lane.b32.xlu0 %v1275_v63, 256 }
  0x81   :  { %3134 = vmatpush3.bf16.msra.mxu0 %v3252_v46  ;;  %1270 = vbcast.lane.b32.xlu1 %v1264_v60, 264 }
  0x82   :  { %3147 = vmatprep.subr.bf16.mxu0 %v3483_v9 }
  0x83   :  { %3142 = vmatpush3.bf16.msra.mxu1 %v3253_v49 }
  0x84   :  { %3136 = vmatmul.mubr.msk.bf16.vlgmr.msra.gmra.mxu0 %vm489_vm1, %v538_v52  ;;  %1288 = vbcast.lane.b32.xlu0 %v1286_v1, 256 }
  0x85   :  { %3148 = vmatpush3.bf16.msra.mxu0 %v3254_v54  ;;  %3151 = vmatprep.mubr.msk.bf16.mxu0 %vm3484_vm0, %v3483_v9 }
  0x86   :  { %3144 = vmatmul.mubr.msk.bf16.vlgmr.msra.gmra.mxu1 %vm489_vm1, %v539_v56  ;;  %3149 = vmatprep.subr.bf16.mxu0 %v3483_v9 }
  0x87   :  { %1281 = vbcast.lane.b32.xlu1 %v1275_v63, 264 }
  0x88   :  { %1299 = vbcast.lane.b32.xlu0 %v1297_v3, 256 }
  0x89   :  { %3150 = vmatpush3.bf16.msra.mxu0 %v3255_v57 }
  0x8b   :  { %1292 = vbcast.lane.b32.xlu1 %v1286_v1, 264 }
  0x8c   :  { %3152 = vmatmul.mubr.msk.bf16.vlgmr.msra.gmra.mxu0 %vm489_vm1, %v540_v62  ;;  %1310 = vbcast.lane.b32.xlu0 %v1308_v5, 256 }
  0x8f   :  { %1303 = vbcast.lane.b32.xlu1 %v1297_v3, 264 }
  0x93   :  { %1314 = vbcast.lane.b32.xlu1 %v1308_v5, 264 }
 0x12c   :  { %v527_v11 = vpop.f32.mrf.mxu0  ;;  %v622_v14 = vpop.f32.mrf.mxu1 }
 0x12d   :  { %v1029_v12 = vrot.slane %v527_v11, %v1028_v10  ;;  %v1022_v21 = vcombine.high %v527_v11, %v527_v11 }
 0x12e   :  { %v3089_v16 = vpop.f32.mrf.mxu0  ;;  %v3097_v19 = vpop.f32.mrf.mxu1 }
 0x12f   :  { %v1037_v17 = vcombine.high %v1029_v12, %v1029_v12  ;;  %v1045_v18 = vrot.slane %v1029_v12, %v1028_v10  ;;  %v1036_v36 = vrot.slane %v1022_v21, %v1028_v10  ;;  %v3830_v21 = vld [vmem:[%s4428_s7] ss:$0 sm:$0xff] }
 0x130   :  { %v530_v20 = vpop.f32.mrf.mxu0  ;;  %v625_v26 = vpop.f32.mrf.mxu1 }
 0x131   :  { %v1074_v22 = vrot.slane %v1045_v18, %v3716_v39  ;;  %v1059_v23 = vrot.slane %v1037_v17, %v1028_v10  ;;  %v1067_v24 = vcombine.high %v1045_v18, %v1045_v18  ;;  %v1052_v52 = vrot.slane %v1036_v36, %v1028_v10 }
 0x132   :  { %v3090_v28 = vpop.f32.mrf.mxu0  ;;  %v3098_v34 = vpop.f32.mrf.mxu1  ;;  %v1038_v53 = vcombine.high %v1036_v36, %v1036_v36 }
 0x133   :  { %v1111_v29 = vadd.f32 %v1074_v22, %v622_v14  ;;  %v1112_v30 = vadd.f32 %v1074_v22, %v625_v26  ;;  %v1078_v31 = vrot.slane %v1059_v23, %v3716_v39  ;;  %v1082_v32 = vrot.slane %v1067_v24, %v3716_v39 }
 0x134   :  { %v678_v35 = vpop.f32.mrf.mxu0  ;;  %v1069_v47 = vcombine.high %v1059_v23, %v1059_v23  ;;  %v1090_v3 = vrot.slane %v1052_v52, %v3716_v39  ;;  %v1066_v11 = vrot.slane %v1038_v53, %v1028_v10  ;;  %v1068_v16 = vcombine.high %v1052_v52, %v1052_v52 }
 0x135   :  { %v1134_v37 = vadd.f32 %v3813_v25, %v1111_v29  ;;  %v1135_v38 = vadd.f32 %v3813_v25, %v1112_v30  ;;  %v1113_v40 = vadd.f32 %v1078_v31, %v678_v35 }
 0x136   :  { %v734_v41 = vpop.f32.mrf.mxu1  ;;  %v3105_v42 = vpop.f32.mrf.mxu0  ;;  %v1086_v59 = vrot.slane %v1069_v47, %v3716_v39  ;;  %v1094_v10 = vrot.slane %v1066_v11, %v3716_v39  ;;  %v1098_v29 = vrot.slane %v1068_v16, %v3716_v39 }
 0x137   :  { %3256 = vtanh.f32 %v1134_v37  ;;  %v1136_v44 = vadd.f32 %v3813_v25, %v1113_v40  ;;  %v1115_v46 = vadd.f32 %v1082_v32, %v734_v41  ;;  %v1070_v40 = vcombine.high %v1066_v11, %v1066_v11 }
 0x138   :  { %3258 = vtanh.f32 %v1135_v38  ;;  %v3113_v48 = vpop.f32.mrf.mxu1  ;;  %v681_v49 = vpop.f32.mrf.mxu0 }
 0x139   :  { %3260 = vtanh.f32 %v1136_v44  ;;  %v1138_v50 = vadd.f32 %v3813_v25, %v1115_v46  ;;  %v1114_v51 = vadd.f32 %v1078_v31, %v681_v49 }
 0x13a   :  { %v737_v54 = vpop.f32.mrf.mxu1  ;;  %v3106_v56 = vpop.f32.mrf.mxu0 }
 0x13b   :  { %3262 = vtanh.f32 %v1138_v50  ;;  %v1137_v57 = vadd.f32 %v3813_v25, %v1114_v51  ;;  %v1116_v58 = vadd.f32 %v1082_v32, %v737_v54 }
 0x13c   :  { %v3114_v60 = vpop.f32.mrf.mxu1  ;;  %v790_v62 = vpop.f32.mrf.mxu0 }
 0x13d   :  { %3264 = vtanh.f32 %v1137_v57  ;;  %v1139_v63 = vadd.f32 %v3813_v25, %v1116_v58  ;;  %v1117_v1 = vadd.f32 %v1086_v59, %v790_v62  ;;  %v1102_v58 = vrot.slane %v1070_v40, %v3716_v39 }
 0x13e   :  { %v846_v5 = vpop.f32.mrf.mxu1  ;;  %v3121_v6 = vpop.f32.mrf.mxu0 }
 0x13f   :  { %3266 = vtanh.f32 %v1139_v63  ;;  %v1140_v7 = vadd.f32 %v3813_v25, %v1117_v1  ;;  %v1119_v8 = vadd.f32 %v1090_v3, %v846_v5 }
 0x140   :  { %v3129_v12 = vpop.f32.mrf.mxu1  ;;  %v793_v14 = vpop.f32.mrf.mxu0 }
 0x141   :  { %3268 = vtanh.f32 %v1140_v7  ;;  %v1142_v17 = vadd.f32 %v3813_v25, %v1119_v8  ;;  %v1118_v18 = vadd.f32 %v1086_v59, %v793_v14 }
 0x142   :  { %v849_v19 = vpop.f32.mrf.mxu1  ;;  %v3122_v20 = vpop.f32.mrf.mxu0 }
 0x143   :  { %3270 = vtanh.f32 %v1142_v17  ;;  %v1141_v22 = vadd.f32 %v3813_v25, %v1118_v18  ;;  %v1120_v23 = vadd.f32 %v1090_v3, %v849_v19 }
 0x144   :  { %v3257_v24 = vpop.eup %3256  ;;  %v3130_v26 = vpop.f32.mrf.mxu1 }
 0x145   :  { %v902_v28 = vpop.f32.mrf.mxu0  ;;  %v3259_v30 = vpop.eup %3258  ;;  %3272 = vtanh.f32 %v1141_v22  ;;  %v1143_v31 = vadd.f32 %v3813_v25, %v1120_v23  ;;  %v1173_v34 = vmul.f32 %v3257_v24, %v3830_v21 }
 0x146   :  { %v1121_v32 = vadd.f32 %v1094_v10, %v902_v28  ;;  %v3261_v35 = vpop.eup %3260  ;;  %v958_v36 = vpop.f32.mrf.mxu1  ;;  %v1174_v38 = vmul.f32 %v3259_v30, %v3830_v21 }
 0x147   :  { %v3137_v37 = vpop.f32.mrf.mxu0  ;;  %3274 = vtanh.f32 %v1143_v31  ;;  %v1123_v42 = vadd.f32 %v1098_v29, %v958_v36  ;;  %v1189_v44 = vsel %vm489_vm1, %v1173_v34, 0.0  ;;  %v1175_v49 = vmul.f32 %v3261_v35, %v3830_v21 }
 0x148   :  { %v1144_v41 = vadd.f32 %v3813_v25, %v1121_v32  ;;  %v3263_v46 = vpop.eup %3262  ;;  %v3145_v47 = vpop.f32.mrf.mxu1  ;;  %1190 = vadd.xlane.f32.xlu0 %v1189_v44  ;;  %v1192_v57 = vsel %vm489_vm1, %v1174_v38, 0.0  ;;  %v3486_v31 = vmov 0  }
 0x149   :  { %v905_v48 = vpop.f32.mrf.mxu0  ;;  %v1146_v50 = vadd.f32 %v3813_v25, %v1123_v42  ;;  %v1195_v54 = vsel %vm489_vm1, %v1175_v49, 0.0  ;;  %v1177_v59 = vmul.f32 %v3263_v46, %v3830_v21  ;;  %3236 = vset.pattern.permute.xlu0 %v3486_v31  ;;  %3237 = vset.pattern.permute.xlu1 %v3486_v31 }
 0x14a   :  { %3276 = vtanh.f32 %v1144_v41  ;;  %v1122_v51 = vadd.f32 %v1094_v10, %v905_v48  ;;  %v3265_v52 = vpop.eup %3264  ;;  %v961_v53 = vpop.f32.mrf.mxu1  ;;  %1196 = vadd.xlane.f32.xlu1 %v1195_v54 }
 0x14b   :  { %v3138_v56 = vpop.f32.mrf.mxu0  ;;  %3278 = vtanh.f32 %v1146_v50  ;;  %v1124_v60 = vadd.f32 %v1098_v29, %v961_v53  ;;  %v1176_v63 = vmul.f32 %v3265_v52, %v3830_v21  ;;  %v1201_v17 = vsel %vm489_vm1, %v1177_v59, 0.0 }
 0x14c   :  { %v1145_v62 = vadd.f32 %v3813_v25, %v1122_v51  ;;  %v3267_v1 = vpop.eup %3266  ;;  %v3146_v3 = vpop.f32.mrf.mxu1  ;;  %1193 = vadd.xlane.f32.xlu0 %v1192_v57  ;;  %v3876_v59 = vsub.s32 7, %v3694_v33 }
 0x14d   :  { %v1014_v5 = vpop.f32.mrf.mxu0  ;;  %v1147_v6 = vadd.f32 %v3813_v25, %v1124_v60  ;;  %v1198_v8 = vsel %vm489_vm1, %v1176_v63, 0.0  ;;  %v1178_v14 = vmul.f32 %v3267_v1, %v3830_v21  ;;  %v1245_v1 = vpop.permute.xlu0 %1244 }
 0x14e   :  { %3280 = vtanh.f32 %v1145_v62  ;;  %v1125_v7 = vadd.f32 %v1102_v58, %v1014_v5  ;;  %v3269_v11 = vpop.eup %3268  ;;  %1199 = vadd.xlane.f32.xlu1 %v1198_v8  ;;  %v1319_v60 = vrot.slane %v3728_v43, %v3876_v59  ;;  %v1249_v62 = vpop.permute.xlu1 %1248 }
 0x14f   :  { %v3153_v12 = vpop.f32.mrf.mxu0  ;;  %3282 = vtanh.f32 %v1147_v6  ;;  %v1179_v18 = vmul.f32 %v3269_v11, %v3830_v21  ;;  %v1204_v10 = vsel %vm489_vm1, %v1178_v14, 0.0 }
 0x150   :  { %v1148_v16 = vadd.f32 %v3813_v25, %v1125_v7  ;;  %v3271_v19 = vpop.eup %3270  ;;  %1202 = vadd.xlane.f32.xlu0 %v1201_v17 }
 0x151   :  { %v1017_v20 = vpop.f32.mrf.mxu0  ;;  %v1207_v28 = vsel %vm489_vm1, %v1179_v18, 0.0  ;;  %v1181_v30 = vmul.f32 %v3271_v19, %v3830_v21  ;;  %v1267_v5 = vpop.permute.xlu0 %1266 }
 0x152   :  { %3284 = vtanh.f32 %v1148_v16  ;;  %v1126_v22 = vadd.f32 %v1102_v58, %v1017_v20  ;;  %v3273_v23 = vpop.eup %3272  ;;  %1205 = vadd.xlane.f32.xlu1 %v1204_v10  ;;  %v1256_v63 = vpop.permute.xlu1 %1255 }
 0x153   :  { %v3154_v24 = vpop.f32.mrf.mxu0  ;;  %v1180_v29 = vmul.f32 %v3273_v23, %v3830_v21 }
 0x154   :  { %v1149_v26 = vadd.f32 %v3813_v25, %v1126_v22  ;;  %v3275_v32 = vpop.eup %3274  ;;  %1208 = vadd.xlane.f32.xlu0 %v1207_v28  ;;  %v1213_v25 = vsel %vm489_vm1, %v1181_v30, 0.0 }
 0x155   :  { %v1210_v34 = vsel %vm489_vm1, %v1180_v29, 0.0  ;;  %v1182_v36 = vmul.f32 %v3275_v32, %v3830_v21  ;;  %v1278_v7 = vpop.permute.xlu0 %1277 }
 0x156   :  { %3286 = vtanh.f32 %v1149_v26  ;;  %1211 = vadd.xlane.f32.xlu1 %v1210_v34  ;;  %v1260_v3 = vpop.permute.xlu1 %1259 }
 0x157   :  { %v3277_v35 = vpop.eup %3276  ;;  %v1216_v41 = vsel %vm489_vm1, %v1182_v36, 0.0 }
 0x158   :  { %v1183_v37 = vmul.f32 %v3277_v35, %v3830_v21  ;;  %v3279_v38 = vpop.eup %3278  ;;  %1214 = vadd.xlane.f32.xlu0 %v1213_v25 }
 0x159   :  { %v1185_v46 = vmul.f32 %v3279_v38, %v3830_v21  ;;  %v1289_v8 = vpop.permute.xlu0 %1288 }
 0x15a   :  { %1217 = vadd.xlane.f32.xlu1 %v1216_v41  ;;  %v1219_v42 = vsel %vm489_vm1, %v1183_v37, 0.0  ;;  %v1271_v6 = vpop.permute.xlu1 %1270 }
 0x15b   :  { %v3281_v40 = vpop.eup %3280  ;;  %v1225_v51 = vsel %vm489_vm1, %v1185_v46, 0.0 }
 0x15c   :  { %v1184_v44 = vmul.f32 %v3281_v40, %v3830_v21  ;;  %v3283_v47 = vpop.eup %3282  ;;  %1220 = vadd.xlane.f32.xlu0 %v1219_v42 }
 0x15d   :  { %v1186_v50 = vmul.f32 %v3283_v47, %v3830_v21  ;;  %v1300_v12 = vpop.permute.xlu0 %1299 }
 0x15e   :  { %v1222_v48 = vsel %vm489_vm1, %v1184_v44, 0.0 }
 0x15f   :  { %v3285_v49 = vpop.eup %3284  ;;  %1223 = vadd.xlane.f32.xlu1 %v1222_v48  ;;  %v1228_v54 = vsel %vm489_vm1, %v1186_v50, 0.0 }
 0x160   :  { %v1187_v52 = vmul.f32 %v3285_v49, %v3830_v21  ;;  %1226 = vadd.xlane.f32.xlu0 %v1225_v51 }
 0x161   :  { %v1311_v16 = vpop.permute.xlu0 %1310 }
 0x162   :  { %v1231_v56 = vsel %vm489_vm1, %v1187_v52, 0.0 }
 0x163   :  { %v3287_v53 = vpop.eup %3286  ;;  %1229 = vadd.xlane.f32.xlu1 %v1228_v54 }
 0x164   :  { %v1188_v57 = vmul.f32 %v3287_v53, %v3830_v21  ;;  %1232 = vadd.xlane.f32.xlu0 %v1231_v56  ;;  %v1282_v21 = vpop.permute.xlu1 %1281 }
 0x166   :  { %v1234_v58 = vsel %vm489_vm1, %v1188_v57, 0.0 }
 0x167   :  { %1235 = vadd.xlane.f32.xlu1 %v1234_v58 }
 0x168   :  { %v1293_v11 = vpop.permute.xlu1 %1292 }
 0x16c   :  { %v1304_v14 = vpop.permute.xlu1 %1303 }
 0x170   :  { %v1315_v17 = vpop.permute.xlu1 %1314 }
 0x178   :  { %1325 = vbcast.lane.b32.xlu1 %v1319_v60, 264 }
 0x17a   :  { %1321 = vbcast.lane.b32.xlu0 %v1319_v60, 256 }
 0x1d1   :  { %v1191_v18 = vpop.xlane.xlu0 %1190 }
 0x1d2   :  { %v3880_v19 = vadd.f32 %v1245_v1, %v1191_v18 }
 0x1d3   :  { %v1197_v43 = vpop.xlane.xlu1 %1196 }
 0x1d4   :  { %1376 = vperm.xlu0 %3236, %v3880_v19   ;;  %v3888_v26 = vadd.f32 %v1256_v63, %v1197_v43 }
 0x1d5   :  { %v1194_v20 = vpop.xlane.xlu0 %1193 }
 0x1d6   :  { %v3883_v22 = vadd.f32 %v1249_v62, %v1194_v20 }
 0x1d7   :  { %v1200_v23 = vpop.xlane.xlu1 %1199 }
 0x1d8   :  { %1379 = vperm.xlu1 %3237, %v3883_v22   ;;  %v3886_v10 = vadd.f32 %v1260_v3, %v1200_v23 }
 0x1d9   :  { %v1203_v24 = vpop.xlane.xlu0 %1202 }
 0x1da   :  { %1385 = vperm.xlu0 %3236, %v3886_v10   ;;  %v3894_v31 = vadd.f32 %v1267_v5, %v1203_v24 }
 0x1db   :  { %v1206_v28 = vpop.xlane.xlu1 %1205 }
 0x1dc   :  { %1382 = vperm.xlu1 %3237, %v3888_v26   ;;  %v3892_v29 = vadd.f32 %v1271_v6, %v1206_v28  ;;  %v1424_v6 = vand.u32 127, %v1026_v27 }
 0x1dd   :  { %v1209_v30 = vpop.xlane.xlu0 %1208 }
 0x1de   :  { %1391 = vperm.xlu0 %3236, %v3892_v29   ;;  %v3900_v36 = vadd.f32 %v1278_v7, %v1209_v30 }
 0x1df   :  { %v1212_v32 = vpop.xlane.xlu1 %1211 }
 0x1e0   :  { %1388 = vperm.xlu1 %3237, %v3894_v31   ;;  %v3898_v34 = vadd.f32 %v1282_v21, %v1212_v32  ;;  %v1429_v21 = vadd.s32 4294967288, %v1424_v6 }
 0x1e1   :  { %v1215_v35 = vpop.xlane.xlu0 %1214 }
 0x1e2   :  { %1397 = vperm.xlu0 %3236, %v3898_v34   ;;  %v3906_v40 = vadd.f32 %v1289_v8, %v1215_v35 }
 0x1e3   :  { %v1218_v25 = vpop.xlane.xlu1 %1217 }
 0x1e4   :  { %1394 = vperm.xlu1 %3237, %v3900_v36   ;;  %v3904_v37 = vadd.f32 %v1293_v11, %v1218_v25  ;;  %v3930_v11 = vsub.s32 %v1424_v6, %v3694_v33 }
 0x1e5   :  { %v1221_v38 = vpop.xlane.xlu0 %1220 }
 0x1e6   :  { %1403 = vperm.xlu0 %3236, %v3904_v37   ;;  %v3912_v46 = vadd.f32 %v1300_v12, %v1221_v38  ;;  %v3933_v12 = vsub.s32 %v1429_v21, %v3694_v33 }
 0x1e8   :  { %v1224_v41 = vpop.xlane.xlu1 %1223  ;;  %1400 = vperm.xlu1 %3237, %v3906_v40  }
 0x1e9   :  { %v3910_v42 = vadd.f32 %v1304_v14, %v1224_v41  ;;  %v1227_v44 = vpop.xlane.xlu0 %1226 }
 0x1ea   :  { %v3918_v50 = vadd.f32 %v1311_v16, %v1227_v44 }
 0x1eb   :  { %1409 = vperm.xlu0 %3236, %v3910_v42  }
 0x1ec   :  { %v1230_v47 = vpop.xlane.xlu1 %1229  ;;  %1406 = vperm.xlu1 %3237, %v3912_v46  }
 0x1ed   :  { %v3916_v48 = vadd.f32 %v1315_v17, %v1230_v47  ;;  %v1233_v49 = vpop.xlane.xlu0 %1232 }
 0x1ef   :  { %1415 = vperm.xlu0 %3236, %v3916_v48  }
 0x1f0   :  { %v1236_v51 = vpop.xlane.xlu1 %1235  ;;  %1412 = vperm.xlu1 %3237, %v3918_v50  }
 0x1f1   :  { %v1322_v52 = vpop.permute.xlu0 %1321 }
 0x1f2   :  { %v3922_v53 = vadd.f32 %v1322_v52, %v1233_v49 }
 0x1f4   :  { %v1326_v54 = vpop.permute.xlu1 %1325  ;;  %1418 = vperm.xlu1 %3237, %v3922_v53  }
 0x1f5   :  { %v3925_v56 = vadd.f32 %v1326_v54, %v1236_v51 }
 0x1f7   :  { %1421 = vperm.xlu0 %3236, %v3925_v56  }
 0x24f   :  { %v1377_v57 = vpop.permute.xlu0 %1376 }
 0x250   :  { %v1428_v28 = vrot.slane %v1377_v57, %v3930_v11 }
 0x253   :  { %v1380_v58 = vpop.permute.xlu1 %1379 }
 0x254   :  { %v1433_v43 = vrot.slane %v1380_v58, %v3933_v12 }
 0x255   :  { %v1386_v60 = vpop.permute.xlu0 %1385 }
 0x256   :  { %v1443_v20 = vrot.slane %v1386_v60, %v3933_v12  ;;  %v1435_v47 = vsel %vm1434_vm2, %v1433_v43, %v1428_v28 }
 0x257   :  { %v1383_v62 = vpop.permute.xlu1 %1382 }
 0x258   :  { %v1439_v17 = vrot.slane %v1383_v62, %v3930_v11 }
 0x259   :  { %v1392_v63 = vpop.permute.xlu0 %1391 }
 0x25a   :  { %v1452_v24 = vrot.slane %v1392_v63, %v3933_v12  ;;  %v1444_v30 = vsel %vm1434_vm2, %v1443_v20, %v1439_v17 }
 0x25b   :  { %v1389_v1 = vpop.permute.xlu1 %1388  ;;  %v1500_v52 = vsel %vm1499_vm3, %v1444_v30, %v1435_v47 }
 0x25c   :  { %v1448_v18 = vrot.slane %v1389_v1, %v3930_v11 }
 0x25d   :  { %v1398_v3 = vpop.permute.xlu0 %1397 }
 0x25e   :  { %v1461_v32 = vrot.slane %v1398_v3, %v3933_v12  ;;  %v1453_v38 = vsel %vm1434_vm2, %v1452_v24, %v1448_v18 }
 0x25f   :  { %v1395_v5 = vpop.permute.xlu1 %1394  ;;  %v1502_v60 = vsel %vm1501_vm4, %v1453_v38, %v1500_v52 }
 0x260   :  { %v1457_v27 = vrot.slane %v1395_v5, %v3930_v11 }
 0x261   :  { %v1404_v7 = vpop.permute.xlu0 %1403 }
 0x262   :  { %v1470_v41 = vrot.slane %v1404_v7, %v3933_v12  ;;  %v1462_v49 = vsel %vm1434_vm2, %v1461_v32, %v1457_v27 }
 0x263   :  { %v1401_v8 = vpop.permute.xlu1 %1400  ;;  %v1504_v63 = vsel %vm1503_vm5, %v1462_v49, %v1502_v60 }
 0x264   :  { %v1466_v33 = vrot.slane %v1401_v8, %v3930_v11 }
 0x266   :  { %v1410_v14 = vpop.permute.xlu0 %1409  ;;  %v1471_v54 = vsel %vm1434_vm2, %v1470_v41, %v1466_v33 }
 0x267   :  { %v1407_v16 = vpop.permute.xlu1 %1406  ;;  %v1479_v51 = vrot.slane %v1410_v14, %v3933_v12  ;;  %v1506_v5 = vsel %vm1505_vm6, %v1471_v54, %v1504_v63 }
 0x268   :  { %v1475_v35 = vrot.slane %v1407_v16, %v3930_v11 }
 0x26a   :  { %v1416_v25 = vpop.permute.xlu0 %1415  ;;  %v1480_v62 = vsel %vm1434_vm2, %v1479_v51, %v1475_v35 }
 0x26b   :  { %v1413_v23 = vpop.permute.xlu1 %1412  ;;  %v1488_v57 = vrot.slane %v1416_v25, %v3933_v12  ;;  %v1508_v21 = vsel %vm1507_vm7, %v1480_v62, %v1506_v5 }
 0x26c   :  { %v1484_v44 = vrot.slane %v1413_v23, %v3930_v11 }
 0x26e   :  { %v1489_v1 = vsel %vm1434_vm2, %v1488_v57, %v1484_v44 }
 0x26f   :  { %v1419_v58 = vpop.permute.xlu1 %1418  ;;  %v1510_v14 = vsel %vm1509_vm8, %v1489_v1, %v1508_v21 }
 0x270   :  { %v1493_v6 = vrot.slane %v1419_v58, %v3930_v11 }
 0x272   :  { %v1422_v3 = vpop.permute.xlu0 %1421 }
 0x273   :  { %v1497_v7 = vrot.slane %v1422_v3, %v3933_v12 }
 0x275   :  { %v1498_v8 = vsel %vm1434_vm2, %v1497_v7, %v1493_v6 }
 0x276   :  { %v1512_v16 = vsel %vm1511_vm9, %v1498_v8, %v1510_v14 }
 0x277   :  { %v1515_v17 = vsel %vm1514_vm10, %v1512_v16, -inf }
 0x278   :  { %1516 = vmax.xlane.f32.xlu1 %v1515_v17 }
 0x301   :  { %v1517_v18 = vpop.xlane.xlu1 %1516 }
 0x302   :  { %v1522_v43 = vrot.slane %v1517_v18, %v3716_v39  ;;  %v1526_v27 = vrot.slane %v1517_v18, %v3735_v45  ;;  %v1538_v24 = vrot.slane %v1517_v18, %v3793_v0  ;;  %v3975_v35 = vrot.slane %v1517_v18, %v3876_v59 }
 0x303   :  { %v1530_v25 = vrot.slane %v1517_v18, %v3768_v55 }
 0x304   :  { %v1559_v20 = vsub.f32 %v3880_v19, %v1522_v43  ;;  %v1560_v23 = vsub.f32 %v3883_v22, %v1522_v43  ;;  %v1561_v28 = vsub.f32 %v3888_v26, %v1526_v27  ;;  %v1568_v32 = vsub.f32 %v3904_v37, %v1538_v24 }
 0x305   :  { %v1562_v19 = vsub.f32 %v3886_v10, %v1526_v27  ;;  %v1574_v22 = vsub.f32 %v3925_v56, %v3975_v35  ;;  %v1563_v44 = vsub.f32 %v3894_v31, %v1530_v25  ;;  %v1534_v37 = vrot.slane %v1517_v18, %v3786_v61 }
 0x306   :  { %v1575_v33 = vmul.f32 1.442695, %v1559_v20  ;;  %v1577_v30 = vmul.f32 1.442695, %v1560_v23  ;;  %v1579_v38 = vmul.f32 1.442695, %v1561_v28  ;;  %v1564_v49 = vsub.f32 %v3892_v29, %v1530_v25 }
 0x307   :  { %v1593_v41 = vmul.f32 1.442695, %v1568_v32  ;;  %v1581_v26 = vmul.f32 1.442695, %v1562_v19  ;;  %v1605_v47 = vmul.f32 1.442695, %v1574_v22  ;;  %v1565_v10 = vsub.f32 %v3900_v36, %v1534_v37 }
 0x308   :  { %3288 = vpow2.f32 %v1575_v33  ;;  %v1583_v51 = vmul.f32 1.442695, %v1563_v44  ;;  %v1585_v56 = vmul.f32 1.442695, %v1564_v49  ;;  %v1566_v54 = vsub.f32 %v3898_v34, %v1534_v37 }
 0x309   :  { %3290 = vpow2.f32 %v1577_v30  ;;  %v1587_v57 = vmul.f32 1.442695, %v1565_v10  ;;  %v1542_v36 = vrot.slane %v1517_v18, %v3799_v2  ;;  %v1567_v60 = vsub.f32 %v3906_v40, %v1538_v24 }
 0x30a   :  { %3292 = vpow2.f32 %v1579_v38  ;;  %v1589_v62 = vmul.f32 1.442695, %v1566_v54  ;;  %v1546_v40 = vrot.slane %v1517_v18, %v3804_v4 }
 0x30b   :  { %3294 = vpow2.f32 %v1593_v41  ;;  %v1569_v1 = vsub.f32 %v3912_v46, %v1542_v36  ;;  %v1591_v3 = vmul.f32 1.442695, %v1567_v60  ;;  %v1570_v6 = vsub.f32 %v3910_v42, %v1542_v36 }
 0x30c   :  { %3296 = vpow2.f32 %v1581_v26  ;;  %v1571_v46 = vsub.f32 %v3918_v50, %v1546_v40  ;;  %v1572_v16 = vsub.f32 %v3916_v48, %v1546_v40  ;;  %v1573_v42 = vsub.f32 %v3922_v53, %v3975_v35 }
 0x30d   :  { %3298 = vpow2.f32 %v1605_v47  ;;  %v1595_v7 = vmul.f32 1.442695, %v1569_v1  ;;  %v1597_v8 = vmul.f32 1.442695, %v1570_v6 }
 0x30e   :  { %3300 = vpow2.f32 %v1583_v51  ;;  %v1599_v17 = vmul.f32 1.442695, %v1571_v46  ;;  %v1601_v43 = vmul.f32 1.442695, %v1572_v16  ;;  %v1603_v20 = vmul.f32 1.442695, %v1573_v42 }
 0x30f   :  { %3302 = vpow2.f32 %v1585_v56 }
 0x310   :  { %3304 = vpow2.f32 %v1587_v57 }
 0x311   :  { %3306 = vpow2.f32 %v1589_v62 }
 0x312   :  { %3308 = vpow2.f32 %v1591_v3 }
 0x313   :  { %3310 = vpow2.f32 %v1595_v7 }
 0x314   :  { %3312 = vpow2.f32 %v1597_v8 }
 0x315   :  { %v3984_v52 = vpop.eup %3288  ;;  %3314 = vpow2.f32 %v1599_v17 }
 0x316   :  { %1624 = vperm.xlu0 %3236, %v3984_v52   ;;  %v3988_v31 = vpop.eup %3290  ;;  %3316 = vpow2.f32 %v1601_v43 }
 0x317   :  { %v3992_v29 = vpop.eup %3292  ;;  %3318 = vpow2.f32 %v1603_v20 }
 0x318   :  { %v3994_v58 = vpop.eup %3294 }
 0x319   :  { %1651 = vperm.xlu1 %3237, %v3994_v58   ;;  %v4000_v63 = vpop.eup %3296 }
 0x31a   :  { %1627 = vperm.xlu0 %3236, %v3988_v31   ;;  %v4003_v34 = vpop.eup %3298 }
 0x31b   :  { %v4006_v5 = vpop.eup %3300 }
 0x31c   :  { %v4012_v21 = vpop.eup %3302 }
 0x31d   :  { %1669 = vperm.xlu1 %3237, %v4003_v34   ;;  %v4016_v14 = vpop.eup %3304 }
 0x31e   :  { %1630 = vperm.xlu0 %3236, %v3992_v29   ;;  %v4020_v18 = vpop.eup %3306 }
 0x31f   :  { %v4025_v50 = vpop.eup %3308 }
 0x320   :  { %v4028_v27 = vpop.eup %3310 }
 0x321   :  { %v4031_v48 = vpop.eup %3312 }
 0x322   :  { %1633 = vperm.xlu0 %3236, %v4000_v63   ;;  %v4034_v23 = vpop.eup %3314 }
 0x323   :  { %v4037_v53 = vpop.eup %3316 }
 0x324   :  { %v4040_v24 = vpop.eup %3318 }
 0x326   :  { %1636 = vperm.xlu0 %3236, %v4006_v5  }
 0x32a   :  { %1639 = vperm.xlu0 %3236, %v4012_v21  }
 0x32e   :  { %1642 = vperm.xlu0 %3236, %v4016_v14  }
 0x332   :  { %1645 = vperm.xlu0 %3236, %v4020_v18  }
 0x336   :  { %1648 = vperm.xlu0 %3236, %v4025_v50  }
 0x33a   :  { %1654 = vperm.xlu0 %3236, %v4028_v27  }
 0x33e   :  { %1657 = vperm.xlu0 %3236, %v4031_v48  }
 0x342   :  { %1660 = vperm.xlu0 %3236, %v4034_v23  }
 0x346   :  { %1663 = vperm.xlu0 %3236, %v4037_v53  }
 0x34a   :  { %1666 = vperm.xlu0 %3236, %v4040_v24  }
 0x391   :  { %v1625_v33 = vpop.permute.xlu0 %1624 }
 0x392   :  { %v1674_v36 = vrot.slane %v1625_v33, %v3930_v11 }
 0x394   :  { %v1652_v47 = vpop.permute.xlu1 %1651 }
 0x395   :  { %v1628_v28 = vpop.permute.xlu0 %1627  ;;  %v1714_v3 = vrot.slane %v1652_v47, %v3933_v12 }
 0x396   :  { %v1678_v51 = vrot.slane %v1628_v28, %v3933_v12 }
 0x398   :  { %v1679_v7 = vsel %vm1434_vm2, %v1678_v51, %v1674_v36  ;;  %v1670_v17 = vpop.permute.xlu1 %1669 }
 0x399   :  { %v1631_v30 = vpop.permute.xlu0 %1630 }
 0x39a   :  { %v1683_v10 = vrot.slane %v1631_v30, %v3930_v11 }
 0x39d   :  { %v1634_v32 = vpop.permute.xlu0 %1633 }
 0x39e   :  { %v1687_v26 = vrot.slane %v1634_v32, %v3933_v12 }
 0x3a0   :  { %v1688_v60 = vsel %vm1434_vm2, %v1687_v26, %v1683_v10 }
 0x3a1   :  { %v1637_v35 = vpop.permute.xlu0 %1636  ;;  %v1743_v42 = vsel %vm1499_vm3, %v1688_v60, %v1679_v7 }
 0x3a2   :  { %v1692_v54 = vrot.slane %v1637_v35, %v3930_v11 }
 0x3a5   :  { %v1640_v25 = vpop.permute.xlu0 %1639 }
 0x3a6   :  { %v1696_v37 = vrot.slane %v1640_v25, %v3933_v12  ;;  %v1741_v25 = vrot.slane %v1670_v17, %v3933_v12 }
 0x3a8   :  { %v1697_v40 = vsel %vm1434_vm2, %v1696_v37, %v1692_v54 }
 0x3a9   :  { %v1643_v19 = vpop.permute.xlu0 %1642  ;;  %v1744_v33 = vsel %vm1501_vm4, %v1697_v40, %v1743_v42 }
 0x3aa   :  { %v1701_v62 = vrot.slane %v1643_v19, %v3930_v11 }
 0x3ad   :  { %v1646_v38 = vpop.permute.xlu0 %1645 }
 0x3ae   :  { %v1705_v56 = vrot.slane %v1646_v38, %v3933_v12 }
 0x3b0   :  { %v1706_v46 = vsel %vm1434_vm2, %v1705_v56, %v1701_v62 }
 0x3b1   :  { %v1649_v41 = vpop.permute.xlu0 %1648  ;;  %v1745_v30 = vsel %vm1503_vm5, %v1706_v46, %v1744_v33 }
 0x3b2   :  { %v1710_v57 = vrot.slane %v1649_v41, %v3930_v11 }
 0x3b4   :  { %v1715_v43 = vsel %vm1434_vm2, %v1714_v3, %v1710_v57 }
 0x3b5   :  { %v1655_v22 = vpop.permute.xlu0 %1654  ;;  %v1746_v19 = vsel %vm1505_vm6, %v1715_v43, %v1745_v30 }
 0x3b6   :  { %v1719_v8 = vrot.slane %v1655_v22, %v3930_v11 }
 0x3b9   :  { %v1658_v44 = vpop.permute.xlu0 %1657 }
 0x3ba   :  { %v1723_v1 = vrot.slane %v1658_v44, %v3933_v12 }
 0x3bc   :  { %v1724_v28 = vsel %vm1434_vm2, %v1723_v1, %v1719_v8 }
 0x3bd   :  { %v1661_v49 = vpop.permute.xlu0 %1660  ;;  %v1747_v41 = vsel %vm1507_vm7, %v1724_v28, %v1746_v19 }
 0x3be   :  { %v1728_v20 = vrot.slane %v1661_v49, %v3930_v11 }
 0x3c1   :  { %v1664_v6 = vpop.permute.xlu0 %1663 }
 0x3c2   :  { %v1732_v16 = vrot.slane %v1664_v6, %v3933_v12  ;;  %v3324_v6 = vld [vmem:[%s4423_s2 + $0x10] sm:$0xff] }
 0x3c4   :  { %v1733_v32 = vsel %vm1434_vm2, %v1732_v16, %v1728_v20  ;;  %v3325_v16 = vld [vmem:[%s4423_s2 + $0x18] sm:$0xff] }
 0x3c5   :  { %v1667_v35 = vpop.permute.xlu0 %1666  ;;  %v1748_v44 = vsel %vm1509_vm8, %v1733_v32, %v1747_v41 }
 0x3c6   :  { %v1737_v38 = vrot.slane %v1667_v35, %v3930_v11 }
 0x3c8   :  { %v1742_v22 = vsel %vm1434_vm2, %v1741_v25, %v1737_v38  ;;  %v3326_v25 = vld [vmem:[%s4423_s2 + $0x20] sm:$0xff] }
 0x3c9   :  { %v1749_v26 = vsel %vm1511_vm9, %v1742_v22, %v1748_v44  ;;  %v3327_v44 = vld [vmem:[%s4423_s2 + $0x28] sm:$0xff] }
 0x3ca   :  { %v1751_v47 = vsel %vm1514_vm10, %v1749_v26, 0.0 }
 0x3cb   :  { %1752 = vadd.xlane.f32.xlu0 %v1751_v47 }
 0x454   :  { %v1753_v37 = vpop.xlane.xlu0 %1752 }
 0x455   :  { %3320 = vrcp.f32 %v1753_v37 }
 0x462   :  { %v3321_v49 = vpop.eup %3320 }
 0x463   :  { %v1775_v51 = vrot.slane %v3321_v49, %v3793_v0  ;;  %v1759_v10 = vrot.slane %v3321_v49, %v3716_v39  ;;  %v1787_v57 = vrot.slane %v3321_v49, %v3876_v59  ;;  %v1763_v62 = vrot.slane %v3321_v49, %v3735_v45 }
 0x465   :  { %v1804_v56 = vmul.f32 %v4025_v50, %v1775_v51  ;;  %v1796_v54 = vmul.f32 %v3984_v52, %v1759_v10  ;;  %v1811_v36 = vmul.f32 %v4003_v34, %v1787_v57  ;;  %v1797_v60 = vmul.f32 %v3988_v31, %v1759_v10 }
 0x466   :  { %v1798_v0 = vmul.f32 %v3992_v29, %v1763_v62  ;;  %v1799_v39 = vmul.f32 %v4000_v63, %v1763_v62  ;;  %v1767_v50 = vrot.slane %v3321_v49, %v3768_v55  ;;  %v1771_v34 = vrot.slane %v3321_v49, %v3786_v61 }
 0x467   :  { %1853 = vperm.xlu0 %3236, %v1804_v56   ;;  %1829 = vperm.xlu1 %3237, %v1796_v54   ;;  %v1805_v29 = vmul.f32 %v3994_v58, %v1775_v51  ;;  %v1779_v63 = vrot.slane %v3321_v49, %v3799_v2  ;;  %v3322_v2 = vld [vmem:[%s4423_s2] sm:$0xff] }
 0x468   :  { %v1800_v59 = vmul.f32 %v4006_v5, %v1767_v50  ;;  %v1801_v52 = vmul.f32 %v4012_v21, %v1767_v50  ;;  %v1802_v45 = vmul.f32 %v4016_v14, %v1771_v34  ;;  %v1803_v31 = vmul.f32 %v4020_v18, %v1771_v34 }
 0x469   :  { %v1806_v55 = vmul.f32 %v4028_v27, %v1779_v63  ;;  %v1807_v5 = vmul.f32 %v4031_v48, %v1779_v63  ;;  %v1783_v21 = vrot.slane %v3321_v49, %v3804_v4  ;;  %v1810_v18 = vmul.f32 %v4040_v24, %v1787_v57  ;;  %v3323_v4 = vld [vmem:[%s4423_s2 + $0x8] sm:$0xff] }
 0x46b   :  { %1874 = vperm.xlu0 %3236, %v1811_v36   ;;  %1832 = vperm.xlu1 %3237, %v1797_v60   ;;  %v1808_v61 = vmul.f32 %v4034_v23, %v1783_v21  ;;  %v1809_v14 = vmul.f32 %v4037_v53, %v1783_v21  ;;  %v3328_v60 = vld [vmem:[%s4423_s2 + $0x30] sm:$0xff] }
 0x46f   :  { %1835 = vperm.xlu1 %3237, %v1798_v0  }
 0x473   :  { %1838 = vperm.xlu1 %3237, %v1799_v39  }
 0x477   :  { %1841 = vperm.xlu1 %3237, %v1800_v59  }
 0x47b   :  { %1844 = vperm.xlu1 %3237, %v1801_v52   ;;  %v3329_v52 = vld [vmem:[%s4423_s2 + $0x38] sm:$0xff] }
 0x47f   :  { %1847 = vperm.xlu1 %3237, %v1802_v45  }
 0x483   :  { %1850 = vperm.xlu1 %3237, %v1803_v31  }
 0x487   :  { %1856 = vperm.xlu1 %3237, %v1805_v29   ;;  %v3330_v29 = vld [vmem:[%s4423_s2 + $0x40] sm:$0xff] }
 0x48b   :  { %1859 = vperm.xlu1 %3237, %v1806_v55  }
 0x48f   :  { %1862 = vperm.xlu1 %3237, %v1807_v5  }
 0x493   :  { %1865 = vperm.xlu1 %3237, %v1808_v61  }
 0x497   :  { %1868 = vperm.xlu1 %3237, %v1809_v14  }
 0x49b   :  { %1871 = vperm.xlu1 %3237, %v1810_v18   ;;  %v3331_v18 = vld [vmem:[%s4423_s2 + $0x48] sm:$0xff] }
 0x4e2   :  { %v4099_v58 = vpop.permute.xlu1 %1829  ;;  %v4151_v0 = vpop.permute.xlu0 %1853 }
 0x4e3   :  { %v1973_v27 = vmul.f32 %v3322_v2, %v4099_v58  ;;  %v1981_v63 = vmul.f32 %v3330_v29, %v4151_v0 }
 0x4e5   :  { %v1989_v53 = vsel %vm489_vm1, %v1973_v27, 0.0 }
 0x4e6   :  { %v4105_v48 = vpop.permute.xlu1 %1832 }
 0x4e7   :  { %v1974_v23 = vmul.f32 %v3323_v4, %v4105_v48 }
 0x4e9   :  { %v1990_v24 = vsel %vm489_vm1, %v1974_v23, 0.0  ;;  %v2025_v23 = vsel %vm489_vm1, %v1981_v63, 0.0 }
 0x4ea   :  { %v1991_v1 = vadd.f32 %v1990_v24, %v1989_v53  ;;  %v4113_v3 = vpop.permute.xlu1 %1835 }
 0x4eb   :  { %v1975_v7 = vmul.f32 %v3324_v6, %v4113_v3 }
 0x4ec   :  { %v1992_v40 = vrot.slane %v1991_v1, 4 }
 0x4ed   :  { %v1998_v43 = vsel %vm489_vm1, %v1975_v7, 0.0 }
 0x4ee   :  { %v1993_v46 = vadd.f32 %v1992_v40, %v1991_v1  ;;  %v4119_v8 = vpop.permute.xlu1 %1838 }
 0x4ef   :  { %v1976_v17 = vmul.f32 %v3325_v16, %v4119_v8 }
 0x4f0   :  { %v1994_v42 = vrot.slane %v1993_v46, 2 }
 0x4f1   :  { %v1999_v20 = vsel %vm489_vm1, %v1976_v17, 0.0  ;;  %v3332_v17 = vld [vmem:[%s4423_s2 + $0x50] sm:$0xff] }
 0x4f2   :  { %v1995_v33 = vadd.f32 %v1994_v42, %v1993_v46  ;;  %v2000_v28 = vadd.f32 %v1999_v20, %v1998_v43  ;;  %v4127_v30 = vpop.permute.xlu1 %1841 }
 0x4f3   :  { %v1977_v19 = vmul.f32 %v3326_v25, %v4127_v30  ;;  %v1915_v25 = vrot.slane %v4151_v0, %v3930_v11 }
 0x4f4   :  { %v1996_v32 = vrot.slane %v1995_v33, 1  ;;  %v2001_v35 = vrot.slane %v2000_v28, 4 }
 0x4f5   :  { %v2007_v49 = vsel %vm489_vm1, %v1977_v19, 0.0  ;;  %v1879_v19 = vrot.slane %v4099_v58, %v3930_v11 }
 0x4f6   :  { %v4133_v38 = vadd.f32 %v1996_v32, %v1995_v33  ;;  %v2002_v41 = vadd.f32 %v2001_v35, %v2000_v28  ;;  %v4135_v22 = vpop.permute.xlu1 %1844  ;;  %v1892_v28 = vrot.slane %v4119_v8, %v3933_v12  ;;  %v3333_v32 = vld [vmem:[%s4423_s2 + $0x58] sm:$0xff]  ;;  %v1888_v8 = vrot.slane %v4113_v3, %v3930_v11 }
 0x4f7   :  { %v1978_v26 = vmul.f32 %v3327_v44, %v4135_v22  ;;  %v1897_v3 = vrot.slane %v4127_v30, %v3930_v11  ;;  %v3335_v30 = vld [vmem:[%s4423_s2 + $0x60] sm:$0xff] }
 0x4f8   :  { %v2078_v47 = vpack.c.bf16 %v4133_v38, %v4133_v38  ;;  %v2003_v37 = vrot.slane %v2002_v41, 2 }
 0x4f9   :  { %v2008_v51 = vsel %vm489_vm1, %v1978_v26, 0.0 }
 0x4fa   :  { %v2004_v10 = vadd.f32 %v2003_v37, %v2002_v41  ;;  %v2009_v56 = vadd.f32 %v2008_v51, %v2007_v49  ;;  %v4145_v54 = vpop.permute.xlu1 %1847  ;;  %v1875_v41 = vpop.permute.xlu0 %1874  ;;  %v1883_v37 = vrot.slane %v4105_v48, %v3933_v12 }
 0x4fb   :  { %v1979_v62 = vmul.f32 %v3328_v60, %v4145_v54  ;;  %v3334_v60 = vld [vmem:[%s4423_s2 + $0x78] sm:$0xff]  ;;  %v1906_v29 = vrot.slane %v4145_v54, %v3930_v11 }
 0x4fc   :  { %v2005_v57 = vrot.slane %v2004_v10, 1  ;;  %v2010_v36 = vrot.slane %v2009_v56, 4  ;;  %v1988_v48 = vmul.f32 %v3334_v60, %v1875_v41 }
 0x4fd   :  { %v2016_v55 = vsel %vm489_vm1, %v1979_v62, 0.0  ;;  %v1893_v62 = vsel %vm1434_vm2, %v1892_v28, %v1888_v8 }
 0x4fe   :  { %v4153_v39 = vadd.f32 %v2005_v57, %v2004_v10  ;;  %v2011_v50 = vadd.f32 %v2010_v36, %v2009_v56  ;;  %v4155_v59 = vpop.permute.xlu1 %1850  ;;  %v1901_v10 = vrot.slane %v4135_v22, %v3933_v12 }
 0x4ff   :  { %v1980_v34 = vmul.f32 %v3329_v52, %v4155_v59  ;;  %v1910_v0 = vrot.slane %v4155_v59, %v3933_v12 }
 0x500   :  { %v2079_v45 = vpack.c.bf16 %v4153_v39, %v4153_v39  ;;  %v2012_v31 = vrot.slane %v2011_v50, 2 }
 0x501   :  { %v2017_v5 = vsel %vm489_vm1, %v1980_v34, 0.0 }
 0x502   :  { %v2013_v21 = vadd.f32 %v2012_v31, %v2011_v50  ;;  %v2018_v61 = vadd.f32 %v2017_v5, %v2016_v55  ;;  %v1857_v14 = vpop.permute.xlu1 %1856  ;;  %v1884_v31 = vsel %vm1434_vm2, %v1883_v37, %v1879_v19  ;;  %v1902_v5 = vsel %vm1434_vm2, %v1901_v10, %v1897_v3  ;;  %v3337_v19 = vld [vmem:[%s4423_s2 + $0x70] sm:$0xff] }
 0x503   :  { %v1982_v2 = vmul.f32 %v3331_v18, %v1857_v14  ;;  %v1919_v50 = vrot.slane %v1857_v14, %v3933_v12  ;;  %v1948_v59 = vsel %vm1499_vm3, %v1893_v62, %v1884_v31  ;;  %v1911_v18 = vsel %vm1434_vm2, %v1910_v0, %v1906_v29 }
 0x504   :  { %v2014_v27 = vrot.slane %v2013_v21, 1  ;;  %v2019_v4 = vrot.slane %v2018_v61, 4 }
 0x505   :  { %v2026_v53 = vsel %vm489_vm1, %v1982_v2, 0.0 }
 0x506   :  { %v4174_v24 = vadd.f32 %v2014_v27, %v2013_v21  ;;  %v2020_v1 = vadd.f32 %v2019_v4, %v2018_v61  ;;  %v2027_v40 = vadd.f32 %v2026_v53, %v2025_v23  ;;  %v1860_v6 = vpop.permute.xlu1 %1859  ;;  %v3336_v27 = vld [vmem:[%s4423_s2 + $0x68] sm:$0xff]  ;;  %v1920_v23 = vsel %vm1434_vm2, %v1919_v50, %v1915_v25 }
 0x507   :  { %v1983_v42 = vmul.f32 %v3332_v17, %v1860_v6  ;;  %v1924_v2 = vrot.slane %v1860_v6, %v3930_v11 }
 0x508   :  { %v2080_v7 = vpack.c.bf16 %v4174_v24, %v4174_v24  ;;  %v2021_v46 = vrot.slane %v2020_v1, 2  ;;  %v2028_v16 = vrot.slane %v2027_v40, 4 }
 0x509   :  { %v2034_v49 = vsel %vm489_vm1, %v1983_v42, 0.0 }
 0x50a   :  { %v2022_v43 = vadd.f32 %v2021_v46, %v2020_v1  ;;  %v2029_v20 = vadd.f32 %v2028_v16, %v2027_v40  ;;  %v1863_v33 = vpop.permute.xlu1 %1862  ;;  %v1949_v46 = vsel %vm1501_vm4, %v1902_v5, %v1948_v59 }
 0x50b   :  { %v1984_v35 = vmul.f32 %v3333_v32, %v1863_v33  ;;  %v1928_v63 = vrot.slane %v1863_v33, %v3933_v12  ;;  %v1950_v42 = vsel %vm1503_vm5, %v1911_v18, %v1949_v46  ;;  %v1946_v32 = vrot.slane %v1875_v41, %v3933_v12 }
 0x50c   :  { %v2023_v44 = vrot.slane %v2022_v43, 1  ;;  %v2030_v26 = vrot.slane %v2029_v20, 2 }
 0x50d   :  { %v2035_v51 = vsel %vm489_vm1, %v1984_v35, 0.0  ;;  %v1929_v16 = vsel %vm1434_vm2, %v1928_v63, %v1924_v2  ;;  %v1951_v35 = vsel %vm1505_vm6, %v1920_v23, %v1950_v42 }
 0x50e   :  { %v4198_v56 = vadd.f32 %v2023_v44, %v2022_v43  ;;  %v2031_v57 = vadd.f32 %v2030_v26, %v2029_v20  ;;  %v2036_v58 = vadd.f32 %v2035_v51, %v2034_v49  ;;  %v1866_v36 = vpop.permute.xlu1 %1865  ;;  %v1952_v26 = vsel %vm1507_vm7, %v1929_v16, %v1951_v35 }
 0x50f   :  { %v1985_v55 = vmul.f32 %v3335_v30, %v1866_v36  ;;  %v1933_v40 = vrot.slane %v1866_v36, %v3930_v11  ;;  %v2053_v49 = vsel %vm489_vm1, %v1988_v48, 0.0 }
 0x510   :  { %v2081_v22 = vpack.c.bf16 %v4198_v56, %v4198_v56  ;;  %v2032_v52 = vrot.slane %v2031_v57, 1  ;;  %v2037_v34 = vrot.slane %v2036_v58, 4 }
 0x511   :  { %v2043_v6 = vsel %vm489_vm1, %v1985_v55, 0.0 }
 0x512   :  { %v4220_v21 = vadd.f32 %v2032_v52, %v2031_v57  ;;  %v2038_v61 = vadd.f32 %v2037_v34, %v2036_v58  ;;  %v1869_v14 = vpop.permute.xlu1 %1868  ;;  %v2069_v52 = vsel %vm1499_vm3, %v4153_v39, %v4133_v38 }
 0x513   :  { %v1937_v54 = vrot.slane %v1869_v14, %v3933_v12  ;;  %v1986_v4 = vmul.f32 %v3336_v27, %v1869_v14  ;;  %v2070_v29 = vsel %vm1501_vm4, %v4174_v24, %v2069_v52 }
 0x514   :  { %v2082_v53 = vpack.c.bf16 %v4220_v21, %v4220_v21  ;;  %v2039_v1 = vrot.slane %v2038_v61, 2  ;;  %v2071_v63 = vsel %vm1503_vm5, %v4198_v56, %v2070_v29 }
 0x515   :  { %v2044_v17 = vsel %vm489_vm1, %v1986_v4, 0.0  ;;  %v1938_v20 = vsel %vm1434_vm2, %v1937_v54, %v1933_v40  ;;  %v2072_v59 = vsel %vm1505_vm6, %v4220_v21, %v2071_v63 }
 0x516   :  { %v2040_v43 = vadd.f32 %v2039_v1, %v2038_v61  ;;  %v2045_v33 = vadd.f32 %v2044_v17, %v2043_v6  ;;  %v1872_v28 = vpop.permute.xlu1 %1871  ;;  %v1953_v51 = vsel %vm1509_vm8, %v1938_v20, %v1952_v26 }
 0x517   :  { %v1942_v25 = vrot.slane %v1872_v28, %v3930_v11  ;;  %v1987_v44 = vmul.f32 %v3337_v19, %v1872_v28 }
 0x518   :  { %v2041_v37 = vrot.slane %v2040_v43, 1  ;;  %v2046_v8 = vrot.slane %v2045_v33, 4 }
 0x519   :  { %v1947_v10 = vsel %vm1434_vm2, %v1946_v32, %v1942_v25  ;;  %v2052_v12 = vsel %vm489_vm1, %v1987_v44, 0.0 }
 0x51a   :  { %v2042_v41 = vadd.f32 %v2041_v37, %v2040_v43  ;;  %v2047_v57 = vadd.f32 %v2046_v8, %v2045_v33  ;;  %v1954_v11 = vsel %vm1511_vm9, %v1947_v10, %v1953_v51  ;;  %v2054_v58 = vadd.f32 %v2053_v49, %v2052_v12 }
 0x51b   :  { %1956 = vst.msk [vmem:[#allocation8] sm:$0xff] %vm1514_vm10, %v1954_v11 }
 0x51c   :  { %v2083_v36 = vpack.c.bf16 %v2042_v41, %v2042_v41  ;;  %v2048_v60 = vrot.slane %v2047_v57, 2  ;;  %v2055_v62 = vrot.slane %v2054_v58, 4  ;;  %v2073_v5 = vsel %vm1507_vm7, %v2042_v41, %v2072_v59 }
 0x51e   :  { %v2049_v3 = vadd.f32 %v2048_v60, %v2047_v57  ;;  %v2056_v0 = vadd.f32 %v2055_v62, %v2054_v58 }
 0x520   :  { %v2050_v50 = vrot.slane %v2049_v3, 1  ;;  %v2057_v48 = vrot.slane %v2056_v0, 2 }
 0x522   :  { %v2051_v34 = vadd.f32 %v2050_v50, %v2049_v3  ;;  %v2058_v31 = vadd.f32 %v2057_v48, %v2056_v0 }
 0x524   :  { %v2084_v30 = vpack.c.bf16 %v2051_v34, %v2051_v34  ;;  %v2059_v55 = vrot.slane %v2058_v31, 1  ;;  %v2074_v14 = vsel %vm1509_vm8, %v2051_v34, %v2073_v5 }
 0x526   :  { %v2060_v61 = vadd.f32 %v2059_v55, %v2058_v31 }
 0x528   :  { %v2075_v18 = vsel %vm1511_vm9, %v2060_v61, %v2074_v14  ;;  %v2085_v2 = vpack.c.bf16 %v2060_v61, %v2060_v61 }
 0x529   :  { %2077 = vst.msk [vmem:[#allocation10] sm:$0xff] %vm489_vm1, %v2075_v18 }
 0x52a   :  { %3460 = dma.done.wait [#allocation3], 16 }
 0x52b   :  { %3461 = vsyncadd [#allocation3], 4294967280 }
 0x52c   :  { %3462 = dma.done.wait [#allocation3 + $0x1], 16 }
 0x52d   :  { %3463 = vsyncadd [#allocation3 + $0x1], 4294967280 }
 0x52e   :  { %3464 = dma.done.wait [#allocation3 + $0x2], 16 }
 0x52f   :  { %3465 = vsyncadd [#allocation3 + $0x2], 4294967280 }
 0x530   :  { %3466 = dma.done.wait [#allocation3 + $0x3], 16 }
 0x531   :  { %3467 = vsyncadd [#allocation3 + $0x3], 4294967280 }
 0x532   :  { %3468 = dma.done.wait [#allocation3 + $0x4], 16 }
 0x533   :  { %3469 = vsyncadd [#allocation3 + $0x4], 4294967280 }
 0x534   :  { %3470 = dma.done.wait [#allocation3 + $0x5], 16 }
 0x535   :  { %3471 = vsyncadd [#allocation3 + $0x5], 4294967280 }
 0x536   :  { %3472 = dma.done.wait [#allocation3 + $0x6], 16 }
 0x537   :  { %3473 = vsyncadd [#allocation3 + $0x6], 4294967280 }
 0x538   :  { %3474 = dma.done.wait [#allocation3 + $0x7], 16 }
 0x539   :  { %3475 = vsyncadd [#allocation3 + $0x7], 4294967280  ;;  %3155 = vmatprep.subr.bf16.mxu1 %v3483_v9  ;;  %3163 = vmatprep.subr.bf16.mxu0 %v3483_v9  ;;  %v2122_v54 = vunpack.c.l.b16 %v2078_v47  ;;  %v2123_v27 = vunpack.c.l.b16 %v2079_v45  ;;  %v2124_v4 = vunpack.c.l.b16 %v2080_v7  ;;  %v2125_v23 = vunpack.c.l.b16 %v2081_v22  ;;  %v3338_v21 = vld [vmem:[%s4430_s9 + $0x8] sm:$0xff]   ;;  %v3340_v46 = vld [vmem:[%s4430_s9] sm:$0xff]  }
 0x53a   :  { %3159 = vmatprep.mubr.msk.bf16.mxu1 %vm3484_vm0, %v3483_v9  ;;  %v2126_v38 = vunpack.c.l.b16 %v2082_v53  ;;  %3167 = vmatprep.mubr.msk.bf16.mxu0 %vm3484_vm0, %v3483_v9  ;;  %v2127_v47 = vunpack.c.l.b16 %v2083_v36  ;;  %v2128_v45 = vunpack.c.l.b16 %v2084_v30  ;;  %v2129_v56 = vunpack.c.l.b16 %v2085_v2  ;;  %v3339_v40 = vld [vmem:[%s4429_s8 + $0x8] sm:$0xff]   ;;  %v3341_v6 = vld [vmem:[%s4429_s8] sm:$0xff]   ;;  %v3343_v33 = vld [vmem:[%s4430_s9 + $0x18] sm:$0xff]  }
 0x53b   :  { %v2130_v39 = vsel %vm1499_vm3, %v2123_v27, %v2122_v54  ;;  %3156 = vmatpush3.bf16.msra.mxu1 %v3338_v21  ;;  %3164 = vmatpush3.bf16.msra.mxu0 %v3339_v40  ;;  %v2103_v17 = vld [vmem:[#allocation2] sm:$0xff]  ;;  %v3342_v20 = vld [vmem:[%s4431_s10 + $0x8] sm:$0xff]   ;;  %v3345_v32 = vld [vmem:[%s4430_s9 + $0x10] sm:$0xff]  }
 0x53c   :  { %v2131_v24 = vsel %vm1501_vm4, %v2124_v4, %v2130_v39  ;;  %3157 = vmatprep.subr.bf16.mxu1 %v3483_v9  ;;  %3165 = vmatprep.subr.bf16.mxu0 %v3483_v9  ;;  %2104 = vst.msk [vmem:[#allocation11] sm:$0xff] %vm489_vm1, %v2103_v17  ;;  %v2105_v43 = vpack.c.bf16 %v2103_v17, %v2103_v17  ;;  %v3344_v28 = vld [vmem:[%s4431_s10] sm:$0xff]   ;;  %v3346_v35 = vld [vmem:[%s4429_s8 + $0x18] sm:$0xff]   ;;  %v3348_v19 = vld [vmem:[%s4429_s8 + $0x10] sm:$0xff]  }
 0x53d   :  { %v2132_v7 = vsel %vm1503_vm5, %v2125_v23, %v2131_v24  ;;  %v3347_v25 = vld [vmem:[%s4431_s10 + $0x18] sm:$0xff]   ;;  %v3349_v44 = vld [vmem:[%s4431_s10 + $0x10] sm:$0xff]   ;;  %v3350_v26 = vld [vmem:[%s4430_s9 + $0x28] sm:$0xff]  }
 0x53e   :  { %v2133_v22 = vsel %vm1505_vm6, %v2126_v38, %v2132_v7  ;;  %v3352_v37 = vld [vmem:[%s4429_s8 + $0x28] sm:$0xff]   ;;  %v3351_v8 = vld [vmem:[%s4430_s9 + $0x20] sm:$0xff]  }
 0x53f   :  { %v2134_v1 = vsel %vm1507_vm7, %v2127_v47, %v2133_v22  ;;  %3158 = vmatpush3.bf16.msra.mxu1 %v3340_v46  ;;  %3166 = vmatpush3.bf16.msra.mxu0 %v3341_v6  ;;  %v3354_v49 = vld [vmem:[%s4429_s8 + $0x20] sm:$0xff]   ;;  %v3353_v51 = vld [vmem:[%s4431_s10 + $0x28] sm:$0xff]   ;;  %s3487_s8 = smov [#allocation8]  }
 0x540   :  { %v2135_v53 = vsel %vm1509_vm8, %v2128_v45, %v2134_v1  ;;  %3171 = vmatprep.subr.bf16.mxu1 %v3483_v9  ;;  %3179 = vmatprep.subr.bf16.mxu0 %v3483_v9  ;;  %v3355_v10 = vld [vmem:[%s4431_s10 + $0x20] sm:$0xff]   ;;  %s2733_s3 = sshll.u32 %s3487_s8, 4  ;;  %s2734_s3 = int_to_ptr.vmem [resolvable:$true] %s2733_s3 }
 0x541   :  { %v2136_v16 = vsel %vm1511_vm9, %v2129_v56, %v2135_v53  ;;  %s3378_s7 = scalar_lea.vmem %s2734_s3, 128  ;;  %p3383_p6 = scmp.lt.s32.totalorder %s2734_s3, %s2734_s3 }
 0x542   :  { %v2137_v42 = vpack.c.b16 %v2136_v16, %v2136_v16  ;;  %3168 = vmatmul.mubr.msk.bf16.vlgmr.msra.gmra.mxu0 %vm489_vm1, %v2105_v43  ;;  %p3379_p5 = scmp.ne.s32.totalorder %s2734_s3, %s3378_s7  ;;  %p3384_p7 = scmp.lt.s32.totalorder %s3378_s7, %s3378_s7 }
 0x543   :  { %3180 = vmatpush3.bf16.msra.mxu0 %v3343_v33  ;;  %3183 = vmatprep.mubr.msk.bf16.mxu0 %vm3484_vm0, %v3483_v9 }
 0x544   :  { %3160 = vmatmul.mubr.msk.bf16.vlgmr.msra.gmra.mxu1 %vm489_vm1, %v2137_v42  ;;  %3181 = vmatprep.subr.bf16.mxu0 %v3483_v9  ;;  %p3385_p8 = por %p3384_p7, %p3383_p6 }
 0x545   :  { %3172 = vmatpush3.bf16.msra.mxu1 %v3342_v20  ;;  %3175 = vmatprep.mubr.msk.bf16.mxu1 %vm3484_vm0, %v3483_v9 }
 0x546   :  { %3173 = vmatprep.subr.bf16.mxu1 %v3483_v9  ;;  %p3386_p9 = pnand %p3385_p8, %p3379_p5 }
 0x547   :  { %3182 = vmatpush3.bf16.msra.mxu0 %v3345_v32 }
 0x548   :  { %3195 = vmatprep.subr.bf16.mxu0 %v3483_v9 }
 0x549   :  { %3174 = vmatpush3.bf16.msra.mxu1 %v3344_v28 }
 0x54a   :  { %3187 = vmatprep.subr.bf16.mxu1 %v3483_v9  ;;  %3184 = vmatmul.mubr.msk.bf16.vlgmr.msra.gmra.mxu0 %vm489_vm1, %v2137_v42 }
 0x54b   :  { %3196 = vmatpush3.bf16.msra.mxu0 %v3347_v25  ;;  %3199 = vmatprep.mubr.msk.bf16.mxu0 %vm3484_vm0, %v3483_v9 }
 0x54c   :  { %3176 = vmatmul.mubr.msk.bf16.vlgmr.msra.gmra.mxu1 %vm489_vm1, %v3638_v15  ;;  %3197 = vmatprep.subr.bf16.mxu0 %v3483_v9 }
 0x54d   :  { %3188 = vmatpush3.bf16.msra.mxu1 %v3346_v35  ;;  %3191 = vmatprep.mubr.msk.bf16.mxu1 %vm3484_vm0, %v3483_v9 }
 0x54e   :  { %3189 = vmatprep.subr.bf16.mxu1 %v3483_v9 }
 0x54f   :  { %3198 = vmatpush3.bf16.msra.mxu0 %v3349_v44 }
 0x550   :  { %3211 = vmatprep.subr.bf16.mxu0 %v3483_v9 }
 0x551   :  { %3190 = vmatpush3.bf16.msra.mxu1 %v3348_v19 }
 0x552   :  { %3203 = vmatprep.subr.bf16.mxu1 %v3483_v9  ;;  %3200 = vmatmul.mubr.msk.bf16.vlgmr.msra.gmra.mxu0 %vm489_vm1, %v3638_v15 }
 0x553   :  { %3212 = vmatpush3.bf16.msra.mxu0 %v3352_v37  ;;  %3215 = vmatprep.mubr.msk.bf16.mxu0 %vm3484_vm0, %v3483_v9 }
 0x554   :  { %3192 = vmatmul.mubr.msk.bf16.vlgmr.msra.gmra.mxu1 %vm489_vm1, %v2105_v43  ;;  %3213 = vmatprep.subr.bf16.mxu0 %v3483_v9 }
 0x555   :  { %3204 = vmatpush3.bf16.msra.mxu1 %v3350_v26  ;;  %3207 = vmatprep.mubr.msk.bf16.mxu1 %vm3484_vm0, %v3483_v9 }
 0x556   :  { %3205 = vmatprep.subr.bf16.mxu1 %v3483_v9 }
 0x557   :  { %3214 = vmatpush3.bf16.msra.mxu0 %v3354_v49 }
 0x559   :  { %3206 = vmatpush3.bf16.msra.mxu1 %v3351_v8 }
 0x55a   :  { %3219 = vmatprep.subr.bf16.mxu1 %v3483_v9  ;;  %3216 = vmatmul.mubr.msk.bf16.vlgmr.msra.gmra.mxu0 %vm489_vm1, %v2105_v43 }
 0x55c   :  { %3208 = vmatmul.mubr.msk.bf16.vlgmr.msra.gmra.mxu1 %vm489_vm1, %v2137_v42 }
 0x55d   :  { %3220 = vmatpush3.bf16.msra.mxu1 %v3353_v51  ;;  %3223 = vmatprep.mubr.msk.bf16.mxu1 %vm3484_vm0, %v3483_v9 }
 0x55e   :  { %3221 = vmatprep.subr.bf16.mxu1 %v3483_v9 }
 0x561   :  { %3222 = vmatpush3.bf16.msra.mxu1 %v3355_v10 }
 0x564   :  { %3224 = vmatmul.mubr.msk.bf16.vlgmr.msra.gmra.mxu1 %vm489_vm1, %v3638_v15 }
 0x565   :  { %3389 = shalt.err (!%p3386_p9)
}
 0x566   :  { %2736 = dma.vmem_to_hbm [thread:$0]  %s2734_s3, 128, %s4436_s15, [#allocation9]  }
 0x567   :  { %s3488_s30 = smov [#allocation10]  }
 0x568   :  { %s2743_s18 = sshll.u32 %s3488_s30, 4  ;;  %s2744_s18 = int_to_ptr.vmem [resolvable:$true] %s2743_s18 }
 0x569   :  { %s3398_s13 = scalar_lea.vmem %s2744_s18, 128  ;;  %p3403_p11 = scmp.lt.s32.totalorder %s2744_s18, %s2744_s18 }
 0x56a   :  { %p3399_p10 = scmp.ne.s32.totalorder %s2744_s18, %s3398_s13  ;;  %p3404_p12 = scmp.lt.s32.totalorder %s3398_s13, %s3398_s13 }
 0x56c   :  { %p3405_p13 = por %p3404_p12, %p3403_p11 }
 0x56e   :  { %p3406_p0 = pnand %p3405_p13, %p3399_p10 }
 0x570   :  { %3409 = shalt.err (!%p3406_p0)
}
 0x571   :  { %2746 = dma.vmem_to_hbm [thread:$0]  %s2744_s18, 128, %s4437_s16, [#allocation9]  }
 0x572   :  { %s3489_s20 = smov [#allocation11]  }
 0x573   :  { %s2753_s21 = sshll.u32 %s3489_s20, 4  ;;  %s2754_s21 = int_to_ptr.vmem [resolvable:$true] %s2753_s21 }
 0x574   :  { %s3418_s11 = scalar_lea.vmem %s2754_s21, 128  ;;  %p3423_p2 = scmp.lt.s32.totalorder %s2754_s21, %s2754_s21 }
 0x575   :  { %p3419_p1 = scmp.ne.s32.totalorder %s2754_s21, %s3418_s11  ;;  %p3424_p3 = scmp.lt.s32.totalorder %s3418_s11, %s3418_s11 }
 0x577   :  { %p3425_p4 = por %p3424_p3, %p3423_p2 }
 0x579   :  { %p3426_p5 = pnand %p3425_p4, %p3419_p1 }
 0x57b   :  { %3429 = shalt.err (!%p3426_p5)
}
 0x57c   :  { %2756 = dma.vmem_to_hbm [thread:$0]  %s2754_s21, 128, %s4438_s17, [#allocation12]   ;;  %v2965_v62 = vld [vmem:[%s4433_s12] ss:$0 sm:$0xff]  ;;  %v2991_v61 = vld [vmem:[%s4433_s12 + $0x1] ss:$0 sm:$0xff] }
 0x57d   :  { %s4445_s23 = sld [smem:[#allocation35_spill]]  ;;  %v3017_v32 = vld [vmem:[%s4433_s12 + $0x2] ss:$0 sm:$0xff]  ;;  %s3490_s6 = smov [#allocation6]  }
 0x57e   :  { %s2723_s8 = sshll.u32 %s3490_s6, 4  ;;  %s2724_s8 = int_to_ptr.vmem [resolvable:$true] %s2723_s8 }
 0x57f   :  { %s3438_s12 = scalar_lea.vmem %s2724_s8, 128  ;;  %p3443_p7 = scmp.lt.s32.totalorder %s2724_s8, %s2724_s8 }
 0x580   :  { %p3439_p6 = scmp.ne.s32.totalorder %s2724_s8, %s3438_s12  ;;  %p3444_p8 = scmp.lt.s32.totalorder %s3438_s12, %s3438_s12 }
 0x582   :  { %p3445_p9 = por %p3444_p8, %p3443_p7 }
 0x583   :  { %v2964_v36 = vld [vmem:[%s4445_s23] ss:$0 sm:$0xff]  ;;  %v2985_v18 = vld [vmem:[%s4445_s23 + $0x1] ss:$0 sm:$0xff]  ;;  %v3011_v26 = vld [vmem:[%s4445_s23 + $0x2] ss:$0 sm:$0xff] }
 0x584   :  { %p3446_p10 = pnand %p3445_p9, %p3439_p6 }
 0x602   :  { %v2242_v15 = vpop.f32.mrf.mxu0 }
 0x604   :  { %v2187_v9 = vpop.f32.mrf.mxu1  ;;  %v3169_v41 = vpop.f32.mrf.mxu0 }
 0x605   :  { %v2243_v11 = vadd.f32 %v2242_v15, %v2187_v9 }
 0x606   :  { %v3161_v12 = vpop.f32.mrf.mxu1  ;;  %v2245_v58 = vpop.f32.mrf.mxu0 }
 0x607   :  { %v2255_v50 = vadd.f32 %v2964_v36, %v2243_v11 }
 0x608   :  { %v2190_v57 = vpop.f32.mrf.mxu1  ;;  %v3170_v3 = vpop.f32.mrf.mxu0 }
 0x60a   :  { %v3162_v60 = vpop.f32.mrf.mxu1  ;;  %v2382_v52 = vpop.f32.mrf.mxu0 }
 0x60c   :  { %v2313_v0 = vpop.f32.mrf.mxu1  ;;  %v3185_v29 = vpop.f32.mrf.mxu0 }
 0x60d   :  { %v2314_v48 = vadd.f32 %v2965_v62, %v2313_v0 }
 0x60e   :  { %v3177_v34 = vpop.f32.mrf.mxu1  ;;  %v2385_v55 = vpop.f32.mrf.mxu0 }
 0x60f   :  { %v2319_v31 = vadd.f32 %v2314_v48, %v2255_v50 }
 0x610   :  { %v2316_v63 = vpop.f32.mrf.mxu1  ;;  %v3186_v5 = vpop.f32.mrf.mxu0 }
 0x611   :  { %v2969_v30 = vmul.f32 -1.442695, %v2319_v31 }
 0x612   :  { %v3178_v59 = vpop.f32.mrf.mxu1  ;;  %v2508_v54 = vpop.f32.mrf.mxu0 }
 0x613   :  { %3356 = vpow2.f32 %v2969_v30  ;;  %v2509_v4 = vadd.f32 %v2991_v61, %v2508_v54 }
 0x614   :  { %v2434_v14 = vpop.f32.mrf.mxu1  ;;  %v3201_v38 = vpop.f32.mrf.mxu0 }
 0x615   :  { %v2435_v2 = vadd.f32 %v2434_v14, %v2382_v52 }
 0x616   :  { %v3193_v27 = vpop.f32.mrf.mxu1  ;;  %v2511_v45 = vpop.f32.mrf.mxu0 }
 0x617   :  { %v2448_v23 = vadd.f32 %v2985_v18, %v2435_v2 }
 0x618   :  { %v2437_v47 = vpop.f32.mrf.mxu1  ;;  %v3202_v56 = vpop.f32.mrf.mxu0 }
 0x619   :  { %v2514_v39 = vadd.f32 %v2509_v4, %v2448_v23 }
 0x61a   :  { %v3194_v24 = vpop.f32.mrf.mxu1  ;;  %v2629_v21 = vpop.f32.mrf.mxu0 }
 0x61b   :  { %v2995_v7 = vmul.f32 -1.442695, %v2514_v39 }
 0x61c   :  { %v2577_v22 = vpop.f32.mrf.mxu1  ;;  %v3217_v46 = vpop.f32.mrf.mxu0 }
 0x61d   :  { %3358 = vpow2.f32 %v2995_v7  ;;  %v2630_v19 = vadd.f32 %v2629_v21, %v2577_v22 }
 0x61e   :  { %v3209_v1 = vpop.f32.mrf.mxu1  ;;  %v2632_v17 = vpop.f32.mrf.mxu0 }
 0x61f   :  { %v2643_v8 = vadd.f32 %v3011_v26, %v2630_v19 }
 0x620   :  { %v3357_v53 = vpop.eup %3356  ;;  %v2580_v40 = vpop.f32.mrf.mxu1 }
 0x621   :  { %v2323_v16 = vadd.f32 1.0, %v3357_v53  ;;  %v3218_v43 = vpop.f32.mrf.mxu0 }
 0x622   :  { %v3210_v6 = vpop.f32.mrf.mxu1 }
 0x623   :  { %3360 = vrcp.f32 %v2323_v16 }
 0x624   :  { %v2703_v42 = vpop.f32.mrf.mxu1 }
 0x625   :  { %v2704_v44 = vadd.f32 %v3017_v32, %v2703_v42 }
 0x626   :  { %v3225_v20 = vpop.f32.mrf.mxu1 }
 0x628   :  { %v2706_v33 = vpop.f32.mrf.mxu1 }
 0x62a   :  { %v3359_v28 = vpop.eup %3358  ;;  %v3226_v35 = vpop.f32.mrf.mxu1 }
 0x62b   :  { %v2518_v25 = vadd.f32 1.0, %v3359_v28 }
 0x62d   :  { %3362 = vrcp.f32 %v2518_v25 }
 0x630   :  { %v3361_v37 = vpop.eup %3360 }
 0x631   :  { %v2709_v49 = vmul.f32 %v3361_v37, %v2704_v44 }
 0x633   :  { %v2710_v51 = vadd.f32 %v2709_v49, %v2643_v8 }
 0x635   :  { %3364 = vtanh.f32 %v2710_v51 }
 0x63a   :  { %v3363_v10 = vpop.eup %3362 }
 0x63b   :  { %v2712_v9 = vsub.f32 1.0, %v3363_v10  ;;  %v2714_v41 = vmul.f32 %v3363_v10, %v3630_v13 }
 0x642   :  { %v3365_v15 = vpop.eup %3364 }
 0x643   :  { %v2713_v12 = vmul.f32 %v3365_v15, %v2712_v9 }
 0x645   :  { %v2715_v57 = vadd.f32 %v2714_v41, %v2713_v12 }
 0x647   :  { %2716 = vst.msk [vmem:[#allocation6] sm:$0xff] %vm489_vm1, %v2715_v57 }
 0x648   :  { %3449 = shalt.err (!%p3446_p10)
}
 0x649   :  { %2726 = dma.vmem_to_hbm [thread:$0]  %s2724_s8, 128, %s4435_s14, [#allocation7]  }
 0x64a   :  { %3476 = dma.done.wait [#allocation7], 128  }
 0x64b   :  { %3477 = vsyncadd [#allocation7], 4294967168 }
 0x64c   :  { %3478 = dma.done.wait [#allocation9], 256  }
 0x64d   :  { %3479 = vsyncadd [#allocation9], 4294967040 }
 0x64e   :  { %3480 = dma.done.wait [#allocation12], 128  }
 0x64f   :  { %3481 = vsyncadd [#allocation12], 4294967168 }
 0x650   :  { %2769 = vsyncpa [#allocation7], 1 }
 0x651   :  { %2770 = vsyncpa [#allocation9], 1 }
 0x652   :  { %2771 = vsyncpa [#allocation12], 1 }
 0x653   :  { %2772 = vsyncmov [#allocation3] }
 0x656   :  { %s2773_s10 = vpop.sfrf %2772 }
 0x657   :  { %p3021_p11 = scmp.ne.s32.totalorder %s2773_s10, 0 }
 0x659   :  { %2777 = shalt.err (%p3021_p11)  }
 0x65a   :  { %2779 = vsyncmov [#allocation3 + $0x1] }
 0x65d   :  { %s2780_s0 = vpop.sfrf %2779 }
 0x65e   :  { %p3022_p12 = scmp.ne.s32.totalorder %s2780_s0, 0 }
 0x660   :  { %2784 = shalt.err (%p3022_p12)  }
 0x661   :  { %2786 = vsyncmov [#allocation3 + $0x2] }
 0x664   :  { %s2787_s30 = vpop.sfrf %2786 }
 0x665   :  { %p3023_p13 = scmp.ne.s32.totalorder %s2787_s30, 0 }
 0x667   :  { %2791 = shalt.err (%p3023_p13)  }
 0x668   :  { %2793 = vsyncmov [#allocation3 + $0x3] }
 0x66b   :  { %s2794_s14 = vpop.sfrf %2793 }
 0x66c   :  { %p3024_p0 = scmp.ne.s32.totalorder %s2794_s14, 0 }
 0x66e   :  { %2798 = shalt.err (%p3024_p0)  }
 0x66f   :  { %2800 = vsyncmov [#allocation3 + $0x4] }
 0x672   :  { %s2801_s18 = vpop.sfrf %2800 }
 0x673   :  { %p3025_p1 = scmp.ne.s32.totalorder %s2801_s18, 0 }
 0x675   :  { %2805 = shalt.err (%p3025_p1)  }
 0x676   :  { %2807 = vsyncmov [#allocation3 + $0x5] }
 0x679   :  { %s2808_s13 = vpop.sfrf %2807 }
 0x67a   :  { %p3026_p2 = scmp.ne.s32.totalorder %s2808_s13, 0 }
 0x67c   :  { %2812 = shalt.err (%p3026_p2)  }
 0x67d   :  { %2814 = vsyncmov [#allocation3 + $0x6] }
 0x680   :  { %s2815_s19 = vpop.sfrf %2814 }
 0x681   :  { %p3027_p3 = scmp.ne.s32.totalorder %s2815_s19, 0 }
 0x683   :  { %2819 = shalt.err (%p3027_p3)  }
 0x684   :  { %2821 = vsyncmov [#allocation3 + $0x7] }
 0x687   :  { %s2822_s1 = vpop.sfrf %2821 }
 0x688   :  { %p3028_p4 = scmp.ne.s32.totalorder %s2822_s1, 0 }
 0x68a   :  { %2826 = shalt.err (%p3028_p4)  }

</bundles_post_ra>
